<compile_context>
chip_gen: v5e
topology: v5e:2x2
jax: 0.10.0
libtpu: 0.0.40
codegen_flags: <defaults>
</compile_context>

<pallas_src>
from functools import partial

import jax
import jax.numpy as jnp
from jax.experimental import pallas as pl
from jax.experimental.pallas import tpu as pltpu


def lstm_kernel(x_ref, wih_ref, whh_ref, b_ref, wfc_ref, bfc_ref,
                out_ref, xproj_ref, *, T, B, H):
    # ---- Hoisted input projection (+ combined bias), one MXU call ----------
    # x_ref: (T*B, I) bf16, wih_ref: (I, 4H) bf16, b_ref: (1, 4H) f32
    xproj_ref[...] = (
        jnp.dot(x_ref[...], wih_ref[...], preferred_element_type=jnp.float32)
        + b_ref[...]
    )

    h = jnp.zeros((B, H), jnp.float32)
    c = jnp.zeros((B, H), jnp.float32)

    # ---- Recurrence: fully unrolled, T is small & static --------------------
    for t in range(T):
        hb = h.astype(jnp.bfloat16)                    # bf16 into MXU, once/step
        xp = xproj_ref[pl.ds(t * B, B), :]             # (B, 4H) f32, static slice

        # Gate-blocked recurrent matmul: read each 128-wide W_hh column block
        # right before its partial dot (keeps live weight vregs low, no big
        # vld burst, no CSE of a 256 KB weight read across the unrolled loop).
        def rec(g):
            return jnp.dot(hb, whh_ref[:, g * H:(g + 1) * H],
                           preferred_element_type=jnp.float32)   # (B, H) f32

        # Kernel gate order is [i, f, o, g] (pre-permuted in prepare_params).
        i_g = jax.nn.sigmoid(xp[:, 0:H]         + rec(0))
        f_g = jax.nn.sigmoid(xp[:, H:2 * H]     + rec(1))
        o_g = jax.nn.sigmoid(xp[:, 2 * H:3 * H] + rec(2))
        g_g = jnp.tanh(      xp[:, 3 * H:4 * H] + rec(3))

        c = f_g * c + i_g * g_g                        # f32 cell state
        h = o_g * jnp.tanh(c)                          # f32 hidden state

    # ---- fc1 on last hidden state + softmax over class dim ------------------
    logits = (jnp.dot(h.astype(jnp.bfloat16), wfc_ref[...],
                      preferred_element_type=jnp.float32)
              + bfc_ref[...])                          # (B, C) f32
    m = jnp.max(logits, axis=1, keepdims=True)
    e = jnp.exp(logits - m)
    denom = jnp.sum(e, axis=1, keepdims=True)
    out_ref[...] = (e * pl.reciprocal(denom, approx=True)).astype(out_ref.dtype)


def prepare_params(params, hidden_size=128):
    """One-time weight preprocessing (reorder, transpose, bias merge, bf16)."""
    w_ih, w_hh, b_ih, b_hh, w_fc, b_fc = params
    H = hidden_size
    C = w_fc.shape[0]

    def reorder(w):
        # PyTorch gate order [i, f, g, o] -> kernel order [i, f, o, g]
        return jnp.concatenate(
            [w[0:H], w[H:2 * H], w[3 * H:4 * H], w[2 * H:3 * H]], axis=0)

    wih_t = jnp.transpose(reorder(w_ih)).astype(jnp.bfloat16)      # (I, 4H) bf16
    whh_t = jnp.transpose(reorder(w_hh)).astype(jnp.bfloat16)      # (H, 4H) bf16
    bias = reorder(b_ih + b_hh).reshape(1, 4 * H).astype(jnp.float32)  # (1, 4H)
    wfc_t = jnp.transpose(w_fc).astype(jnp.bfloat16)               # (H, C)  bf16
    bfc = b_fc.reshape(1, C).astype(jnp.float32)                   # (1, C)
    return (wih_t, whh_t, bias, wfc_t, bfc)


@jax.jit
def lstm_forward(x, prepped):
    """x: (B, T, I) float32; prepped = prepare_params(...). Returns (B, C)."""
    wih_t, whh_t, bias, wfc_t, bfc = prepped
    B, T, I = x.shape
    H = whh_t.shape[0]
    C = wfc_t.shape[1]

    # Time-major, flattened over (T, B) so the input projection is one matmul.
    x_flat = (jnp.transpose(x, (1, 0, 2))
              .reshape(T * B, I)
              .astype(jnp.bfloat16))                               # (T*B, I)

    kernel = partial(lstm_kernel, T=T, B=B, H=H)
    vmem_spec = pl.BlockSpec(memory_space=pltpu.MemorySpace.VMEM)

    def nbytes(a):
        return a.size * a.dtype.itemsize

    cost = pl.CostEstimate(
        flops=(2 * T * B * I * 4 * H            # input projection
               + 2 * T * B * H * 4 * H          # recurrence
               + 2 * B * H * C),                # fc1
        transcendentals=T * B * 5 * H + B * C,  # sigmoids/tanhs + softmax exp
        bytes_accessed=(nbytes(x_flat) + nbytes(wih_t) + nbytes(whh_t)
                        + nbytes(bias) + nbytes(wfc_t) + nbytes(bfc)
                        + B * C * 4),
    )

    # Small problem: everything fits VMEM on all generations -> no grid.
    return pl.pallas_call(
        kernel,
        out_shape=jax.ShapeDtypeStruct((B, C), jnp.float32),
        in_specs=[vmem_spec] * 6,
        out_specs=vmem_spec,
        scratch_shapes=[pltpu.VMEM((T * B, 4 * H), jnp.float32)],
        cost_estimate=cost,
    )(x_flat, wih_t, whh_t, bias, wfc_t, bfc)


def init_params(key, input_size=6, hidden_size=128, num_classes=6):
    # PyTorch nn.LSTM / nn.Linear default init: U(-1/sqrt(H), 1/sqrt(H)).
    ks = jax.random.split(key, 6)
    k_lstm = 1.0 / jnp.sqrt(hidden_size)
    k_fc = 1.0 / jnp.sqrt(hidden_size)
    w_ih = jax.random.uniform(ks[0], (4 * hidden_size, input_size),
                              jnp.float32, -k_lstm, k_lstm)
    w_hh = jax.random.uniform(ks[1], (4 * hidden_size, hidden_size),
                              jnp.float32, -k_lstm, k_lstm)
    b_ih = jax.random.uniform(ks[2], (4 * hidden_size,), jnp.float32, -k_lstm, k_lstm)
    b_hh = jax.random.uniform(ks[3], (4 * hidden_size,), jnp.float32, -k_lstm, k_lstm)
    w_fc = jax.random.uniform(ks[4], (num_classes, hidden_size),
                              jnp.float32, -k_fc, k_fc)
    b_fc = jax.random.uniform(ks[5], (num_classes,), jnp.float32, -k_fc, k_fc)
    return (w_ih, w_hh, b_ih, b_hh, w_fc, b_fc)


def _reference(x, params):
    """Pure-JAX f32 reference mirroring PyTorch LSTM semantics."""
    w_ih, w_hh, b_ih, b_hh, w_fc, b_fc = params
    B, T, I = x.shape
    H = w_hh.shape[1]
    h = jnp.zeros((B, H), jnp.float32)
    c = jnp.zeros((B, H), jnp.float32)
    for t in range(T):
        gates = x[:, t, :] @ w_ih.T + h @ w_hh.T + b_ih + b_hh
        i_g = jax.nn.sigmoid(gates[:, 0:H])
        f_g = jax.nn.sigmoid(gates[:, H:2 * H])
        g_g = jnp.tanh(gates[:, 2 * H:3 * H])
        o_g = jax.nn.sigmoid(gates[:, 3 * H:4 * H])
        c = f_g * c + i_g * g_g
        h = o_g * jnp.tanh(c)
    logits = h @ w_fc.T + b_fc
    return jax.nn.softmax(logits, axis=1)


if __name__ == "__main__":
    key = jax.random.PRNGKey(0)
    k_x, k_p = jax.random.split(key)

    B, T, I = 8, 8, 6       # batch, seq, input features (LSTM input_size=6)
    x = jax.random.normal(k_x, (B, T, I), jnp.float32)
    params = init_params(k_p, input_size=I, hidden_size=128, num_classes=6)

    # One-time weight prep (gate reorder, transposes, bias merge, bf16 cast).
    prepped = prepare_params(params, hidden_size=128)

    out = lstm_forward(x, prepped)
    out = jax.block_until_ready(out)

    ref = _reference(x, params)
    assert out.shape == (B, 6)
    # Tolerance relaxed vs. a pure-f32 path: all matmuls use bf16 MXU operands
    # (f32 accumulate), errors compound over 8 recurrent steps, and softmax
    # uses an approx reciprocal (rows sum to 1 only to ~1e-3 relative).
    assert jnp.allclose(out, ref, atol=2e-2, rtol=2e-2), "mismatch vs reference"

    print("KERNEL_OK")
</pallas_src>

<mosaic_0001>
module attributes {stable_mosaic.version = 11 : i64} {
  func.func @lstm_kernel(%arg0: memref<64x6xbf16, #tpu.memory_space<vmem>>, %arg1: memref<6x512xbf16, #tpu.memory_space<vmem>>, %arg2: memref<128x512xbf16, #tpu.memory_space<vmem>>, %arg3: memref<1x512xf32, #tpu.memory_space<vmem>>, %arg4: memref<128x6xbf16, #tpu.memory_space<vmem>>, %arg5: memref<1x6xf32, #tpu.memory_space<vmem>>, %arg6: memref<8x6xf32, #tpu.memory_space<vmem>>, %arg7: memref<64x512xf32, #tpu.memory_space<vmem>>) attributes {dimension_semantics = [], scalar_prefetch = 0 : i64, scratch_operands = 1 : i64, tpu.core_type = #tpu.core_type<tc>} {
    %c0 = arith.constant 0 : index
    %c0_0 = arith.constant 0 : index
    %0 = vector.load %arg0[%c0, %c0_0] : memref<64x6xbf16, #tpu.memory_space<vmem>>, vector<64x6xbf16>
    %c0_1 = arith.constant 0 : index
    %c0_2 = arith.constant 0 : index
    %1 = vector.load %arg1[%c0_1, %c0_2] : memref<6x512xbf16, #tpu.memory_space<vmem>>, vector<6x512xbf16>
    %cst = arith.constant dense<0.000000e+00> : vector<64x512xf32>
    %2 = tpu.matmul %0, %1, %cst {dimension_numbers = #tpu.dot_dimension_numbers<[1], [0], [0], [1], [0, 0, 1, 1], [], []>} : vector<64x6xbf16>, vector<6x512xbf16>, vector<64x512xf32> -> vector<64x512xf32>
    %c0_3 = arith.constant 0 : index
    %c0_4 = arith.constant 0 : index
    %3 = vector.load %arg3[%c0_3, %c0_4] : memref<1x512xf32, #tpu.memory_space<vmem>>, vector<1x512xf32>
    %4 = vector.broadcast %3 : vector<1x512xf32> to vector<64x512xf32>
    %5 = arith.addf %2, %4 : vector<64x512xf32>
    %c0_5 = arith.constant 0 : index
    %c0_6 = arith.constant 0 : index
    %6 = vector.load %arg7[%c0_5, %c0_6] : memref<64x512xf32, #tpu.memory_space<vmem>>, vector<64x512xf32>
    tpu.vector_store %arg7[%c0_5, %c0_6], %5 {strides = array<i32>} : memref<64x512xf32, #tpu.memory_space<vmem>>, vector<64x512xf32>,
    %cst_7 = arith.constant 0.000000e+00 : f32
    %7 = vector.broadcast %cst_7 : f32 to vector<8x128xf32>
    %cst_8 = arith.constant 0.000000e+00 : f32
    %8 = vector.broadcast %cst_8 : f32 to vector<8x128xf32>
    %9 = arith.truncf %7 : vector<8x128xf32> to vector<8x128xbf16>
    %c0_9 = arith.constant 0 : index
    %c0_10 = arith.constant 0 : index
    %10 = vector.load %arg7[%c0_9, %c0_10] : memref<64x512xf32, #tpu.memory_space<vmem>>, vector<8x512xf32>
    %11 = vector.extract_strided_slice %10 {offsets = [0, 0], sizes = [8, 128], strides = [1, 1]} : vector<8x512xf32> to vector<8x128xf32>
    %c0_11 = arith.constant 0 : index
    %c0_12 = arith.constant 0 : index
    %12 = vector.load %arg2[%c0_11, %c0_12] : memref<128x512xbf16, #tpu.memory_space<vmem>>, vector<128x128xbf16>
    %cst_13 = arith.constant dense<0.000000e+00> : vector<8x128xf32>
    %13 = tpu.matmul %9, %12, %cst_13 {dimension_numbers = #tpu.dot_dimension_numbers<[1], [0], [0], [1], [0, 0, 1, 1], [], []>} : vector<8x128xbf16>, vector<128x128xbf16>, vector<8x128xf32> -> vector<8x128xf32>
    %14 = arith.addf %11, %13 : vector<8x128xf32>
    %15 = arith.negf %14 : vector<8x128xf32>
    %16 = math.exp %15 : vector<8x128xf32>
    %cst_14 = arith.constant 1.000000e+00 : f32
    %17 = vector.broadcast %cst_14 : f32 to vector<8x128xf32>
    %18 = arith.addf %17, %16 : vector<8x128xf32>
    %19 = arith.divf %17, %18 : vector<8x128xf32>
    %20 = vector.extract_strided_slice %10 {offsets = [0, 128], sizes = [8, 128], strides = [1, 1]} : vector<8x512xf32> to vector<8x128xf32>
    %c0_15 = arith.constant 0 : index
    %c128 = arith.constant 128 : index
    %21 = vector.load %arg2[%c0_15, %c128] : memref<128x512xbf16, #tpu.memory_space<vmem>>, vector<128x128xbf16>
    %cst_16 = arith.constant dense<0.000000e+00> : vector<8x128xf32>
    %22 = tpu.matmul %9, %21, %cst_16 {dimension_numbers = #tpu.dot_dimension_numbers<[1], [0], [0], [1], [0, 0, 1, 1], [], []>} : vector<8x128xbf16>, vector<128x128xbf16>, vector<8x128xf32> -> vector<8x128xf32>
    %23 = arith.addf %20, %22 : vector<8x128xf32>
    %24 = arith.negf %23 : vector<8x128xf32>
    %25 = math.exp %24 : vector<8x128xf32>
    %cst_17 = arith.constant 1.000000e+00 : f32
    %26 = vector.broadcast %cst_17 : f32 to vector<8x128xf32>
    %27 = arith.addf %26, %25 : vector<8x128xf32>
    %28 = arith.divf %26, %27 : vector<8x128xf32>
    %29 = vector.extract_strided_slice %10 {offsets = [0, 256], sizes = [8, 128], strides = [1, 1]} : vector<8x512xf32> to vector<8x128xf32>
    %c0_18 = arith.constant 0 : index
    %c256 = arith.constant 256 : index
    %30 = vector.load %arg2[%c0_18, %c256] : memref<128x512xbf16, #tpu.memory_space<vmem>>, vector<128x128xbf16>
    %cst_19 = arith.constant dense<0.000000e+00> : vector<8x128xf32>
    %31 = tpu.matmul %9, %30, %cst_19 {dimension_numbers = #tpu.dot_dimension_numbers<[1], [0], [0], [1], [0, 0, 1, 1], [], []>} : vector<8x128xbf16>, vector<128x128xbf16>, vector<8x128xf32> -> vector<8x128xf32>
    %32 = arith.addf %29, %31 : vector<8x128xf32>
    %33 = arith.negf %32 : vector<8x128xf32>
    %34 = math.exp %33 : vector<8x128xf32>
    %cst_20 = arith.constant 1.000000e+00 : f32
    %35 = vector.broadcast %cst_20 : f32 to vector<8x128xf32>
    %36 = arith.addf %35, %34 : vector<8x128xf32>
    %37 = arith.divf %35, %36 : vector<8x128xf32>
    %38 = vector.extract_strided_slice %10 {offsets = [0, 384], sizes = [8, 128], strides = [1, 1]} : vector<8x512xf32> to vector<8x128xf32>
    %c0_21 = arith.constant 0 : index
    %c384 = arith.constant 384 : index
    %39 = vector.load %arg2[%c0_21, %c384] : memref<128x512xbf16, #tpu.memory_space<vmem>>, vector<128x128xbf16>
    %cst_22 = arith.constant dense<0.000000e+00> : vector<8x128xf32>
    %40 = tpu.matmul %9, %39, %cst_22 {dimension_numbers = #tpu.dot_dimension_numbers<[1], [0], [0], [1], [0, 0, 1, 1], [], []>} : vector<8x128xbf16>, vector<128x128xbf16>, vector<8x128xf32> -> vector<8x128xf32>
    %41 = arith.addf %38, %40 : vector<8x128xf32>
    %42 = math.tanh %41 : vector<8x128xf32>
    %43 = arith.mulf %28, %8 : vector<8x128xf32>
    %44 = arith.mulf %19, %42 : vector<8x128xf32>
    %45 = arith.addf %43, %44 : vector<8x128xf32>
    %46 = math.tanh %45 : vector<8x128xf32>
    %47 = arith.mulf %37, %46 : vector<8x128xf32>
    %48 = arith.truncf %47 : vector<8x128xf32> to vector<8x128xbf16>
    %c8 = arith.constant 8 : index
    %c0_23 = arith.constant 0 : index
    %49 = vector.load %arg7[%c8, %c0_23] : memref<64x512xf32, #tpu.memory_space<vmem>>, vector<8x512xf32>
    %50 = vector.extract_strided_slice %49 {offsets = [0, 0], sizes = [8, 128], strides = [1, 1]} : vector<8x512xf32> to vector<8x128xf32>
    %c0_24 = arith.constant 0 : index
    %c0_25 = arith.constant 0 : index
    %51 = vector.load %arg2[%c0_24, %c0_25] : memref<128x512xbf16, #tpu.memory_space<vmem>>, vector<128x128xbf16>
    %cst_26 = arith.constant dense<0.000000e+00> : vector<8x128xf32>
    %52 = tpu.matmul %48, %51, %cst_26 {dimension_numbers = #tpu.dot_dimension_numbers<[1], [0], [0], [1], [0, 0, 1, 1], [], []>} : vector<8x128xbf16>, vector<128x128xbf16>, vector<8x128xf32> -> vector<8x128xf32>
    %53 = arith.addf %50, %52 : vector<8x128xf32>
    %54 = arith.negf %53 : vector<8x128xf32>
    %55 = math.exp %54 : vector<8x128xf32>
    %cst_27 = arith.constant 1.000000e+00 : f32
    %56 = vector.broadcast %cst_27 : f32 to vector<8x128xf32>
    %57 = arith.addf %56, %55 : vector<8x128xf32>
    %58 = arith.divf %56, %57 : vector<8x128xf32>
    %59 = vector.extract_strided_slice %49 {offsets = [0, 128], sizes = [8, 128], strides = [1, 1]} : vector<8x512xf32> to vector<8x128xf32>
    %c0_28 = arith.constant 0 : index
    %c128_29 = arith.constant 128 : index
    %60 = vector.load %arg2[%c0_28, %c128_29] : memref<128x512xbf16, #tpu.memory_space<vmem>>, vector<128x128xbf16>
    %cst_30 = arith.constant dense<0.000000e+00> : vector<8x128xf32>
    %61 = tpu.matmul %48, %60, %cst_30 {dimension_numbers = #tpu.dot_dimension_numbers<[1], [0], [0], [1], [0, 0, 1, 1], [], []>} : vector<8x128xbf16>, vector<128x128xbf16>, vector<8x128xf32> -> vector<8x128xf32>
    %62 = arith.addf %59, %61 : vector<8x128xf32>
    %63 = arith.negf %62 : vector<8x128xf32>
    %64 = math.exp %63 : vector<8x128xf32>
    %cst_31 = arith.constant 1.000000e+00 : f32
    %65 = vector.broadcast %cst_31 : f32 to vector<8x128xf32>
    %66 = arith.addf %65, %64 : vector<8x128xf32>
    %67 = arith.divf %65, %66 : vector<8x128xf32>
    %68 = vector.extract_strided_slice %49 {offsets = [0, 256], sizes = [8, 128], strides = [1, 1]} : vector<8x512xf32> to vector<8x128xf32>
    %c0_32 = arith.constant 0 : index
    %c256_33 = arith.constant 256 : index
    %69 = vector.load %arg2[%c0_32, %c256_33] : memref<128x512xbf16, #tpu.memory_space<vmem>>, vector<128x128xbf16>
    %cst_34 = arith.constant dense<0.000000e+00> : vector<8x128xf32>
    %70 = tpu.matmul %48, %69, %cst_34 {dimension_numbers = #tpu.dot_dimension_numbers<[1], [0], [0], [1], [0, 0, 1, 1], [], []>} : vector<8x128xbf16>, vector<128x128xbf16>, vector<8x128xf32> -> vector<8x128xf32>
    %71 = arith.addf %68, %70 : vector<8x128xf32>
    %72 = arith.negf %71 : vector<8x128xf32>
    %73 = math.exp %72 : vector<8x128xf32>
    %cst_35 = arith.constant 1.000000e+00 : f32
    %74 = vector.broadcast %cst_35 : f32 to vector<8x128xf32>
    %75 = arith.addf %74, %73 : vector<8x128xf32>
    %76 = arith.divf %74, %75 : vector<8x128xf32>
    %77 = vector.extract_strided_slice %49 {offsets = [0, 384], sizes = [8, 128], strides = [1, 1]} : vector<8x512xf32> to vector<8x128xf32>
    %c0_36 = arith.constant 0 : index
    %c384_37 = arith.constant 384 : index
    %78 = vector.load %arg2[%c0_36, %c384_37] : memref<128x512xbf16, #tpu.memory_space<vmem>>, vector<128x128xbf16>
    %cst_38 = arith.constant dense<0.000000e+00> : vector<8x128xf32>
    %79 = tpu.matmul %48, %78, %cst_38 {dimension_numbers = #tpu.dot_dimension_numbers<[1], [0], [0], [1], [0, 0, 1, 1], [], []>} : vector<8x128xbf16>, vector<128x128xbf16>, vector<8x128xf32> -> vector<8x128xf32>
    %80 = arith.addf %77, %79 : vector<8x128xf32>
    %81 = math.tanh %80 : vector<8x128xf32>
    %82 = arith.mulf %67, %45 : vector<8x128xf32>
    %83 = arith.mulf %58, %81 : vector<8x128xf32>
    %84 = arith.addf %82, %83 : vector<8x128xf32>
    %85 = math.tanh %84 : vector<8x128xf32>
    %86 = arith.mulf %76, %85 : vector<8x128xf32>
    %87 = arith.truncf %86 : vector<8x128xf32> to vector<8x128xbf16>
    %c16 = arith.constant 16 : index
    %c0_39 = arith.constant 0 : index
    %88 = vector.load %arg7[%c16, %c0_39] : memref<64x512xf32, #tpu.memory_space<vmem>>, vector<8x512xf32>
    %89 = vector.extract_strided_slice %88 {offsets = [0, 0], sizes = [8, 128], strides = [1, 1]} : vector<8x512xf32> to vector<8x128xf32>
    %c0_40 = arith.constant 0 : index
    %c0_41 = arith.constant 0 : index
    %90 = vector.load %arg2[%c0_40, %c0_41] : memref<128x512xbf16, #tpu.memory_space<vmem>>, vector<128x128xbf16>
    %cst_42 = arith.constant dense<0.000000e+00> : vector<8x128xf32>
    %91 = tpu.matmul %87, %90, %cst_42 {dimension_numbers = #tpu.dot_dimension_numbers<[1], [0], [0], [1], [0, 0, 1, 1], [], []>} : vector<8x128xbf16>, vector<128x128xbf16>, vector<8x128xf32> -> vector<8x128xf32>
    %92 = arith.addf %89, %91 : vector<8x128xf32>
    %93 = arith.negf %92 : vector<8x128xf32>
    %94 = math.exp %93 : vector<8x128xf32>
    %cst_43 = arith.constant 1.000000e+00 : f32
    %95 = vector.broadcast %cst_43 : f32 to vector<8x128xf32>
    %96 = arith.addf %95, %94 : vector<8x128xf32>
    %97 = arith.divf %95, %96 : vector<8x128xf32>
    %98 = vector.extract_strided_slice %88 {offsets = [0, 128], sizes = [8, 128], strides = [1, 1]} : vector<8x512xf32> to vector<8x128xf32>
    %c0_44 = arith.constant 0 : index
    %c128_45 = arith.constant 128 : index
    %99 = vector.load %arg2[%c0_44, %c128_45] : memref<128x512xbf16, #tpu.memory_space<vmem>>, vector<128x128xbf16>
    %cst_46 = arith.constant dense<0.000000e+00> : vector<8x128xf32>
    %100 = tpu.matmul %87, %99, %cst_46 {dimension_numbers = #tpu.dot_dimension_numbers<[1], [0], [0], [1], [0, 0, 1, 1], [], []>} : vector<8x128xbf16>, vector<128x128xbf16>, vector<8x128xf32> -> vector<8x128xf32>
    %101 = arith.addf %98, %100 : vector<8x128xf32>
    %102 = arith.negf %101 : vector<8x128xf32>
    %103 = math.exp %102 : vector<8x128xf32>
    %cst_47 = arith.constant 1.000000e+00 : f32
    %104 = vector.broadcast %cst_47 : f32 to vector<8x128xf32>
    %105 = arith.addf %104, %103 : vector<8x128xf32>
    %106 = arith.divf %104, %105 : vector<8x128xf32>
    %107 = vector.extract_strided_slice %88 {offsets = [0, 256], sizes = [8, 128], strides = [1, 1]} : vector<8x512xf32> to vector<8x128xf32>
    %c0_48 = arith.constant 0 : index
    %c256_49 = arith.constant 256 : index
    %108 = vector.load %arg2[%c0_48, %c256_49] : memref<128x512xbf16, #tpu.memory_space<vmem>>, vector<128x128xbf16>
    %cst_50 = arith.constant dense<0.000000e+00> : vector<8x128xf32>
    %109 = tpu.matmul %87, %108, %cst_50 {dimension_numbers = #tpu.dot_dimension_numbers<[1], [0], [0], [1], [0, 0, 1, 1], [], []>} : vector<8x128xbf16>, vector<128x128xbf16>, vector<8x128xf32> -> vector<8x128xf32>
    %110 = arith.addf %107, %109 : vector<8x128xf32>
    %111 = arith.negf %110 : vector<8x128xf32>
    %112 = math.exp %111 : vector<8x128xf32>
    %cst_51 = arith.constant 1.000000e+00 : f32
    %113 = vector.broadcast %cst_51 : f32 to vector<8x128xf32>
    %114 = arith.addf %113, %112 : vector<8x128xf32>
    %115 = arith.divf %113, %114 : vector<8x128xf32>
    %116 = vector.extract_strided_slice %88 {offsets = [0, 384], sizes = [8, 128], strides = [1, 1]} : vector<8x512xf32> to vector<8x128xf32>
    %c0_52 = arith.constant 0 : index
    %c384_53 = arith.constant 384 : index
    %117 = vector.load %arg2[%c0_52, %c384_53] : memref<128x512xbf16, #tpu.memory_space<vmem>>, vector<128x128xbf16>
    %cst_54 = arith.constant dense<0.000000e+00> : vector<8x128xf32>
    %118 = tpu.matmul %87, %117, %cst_54 {dimension_numbers = #tpu.dot_dimension_numbers<[1], [0], [0], [1], [0, 0, 1, 1], [], []>} : vector<8x128xbf16>, vector<128x128xbf16>, vector<8x128xf32> -> vector<8x128xf32>
    %119 = arith.addf %116, %118 : vector<8x128xf32>
    %120 = math.tanh %119 : vector<8x128xf32>
    %121 = arith.mulf %106, %84 : vector<8x128xf32>
    %122 = arith.mulf %97, %120 : vector<8x128xf32>
    %123 = arith.addf %121, %122 : vector<8x128xf32>
    %124 = math.tanh %123 : vector<8x128xf32>
    %125 = arith.mulf %115, %124 : vector<8x128xf32>
    %126 = arith.truncf %125 : vector<8x128xf32> to vector<8x128xbf16>
    %c24 = arith.constant 24 : index
    %c0_55 = arith.constant 0 : index
    %127 = vector.load %arg7[%c24, %c0_55] : memref<64x512xf32, #tpu.memory_space<vmem>>, vector<8x512xf32>
    %128 = vector.extract_strided_slice %127 {offsets = [0, 0], sizes = [8, 128], strides = [1, 1]} : vector<8x512xf32> to vector<8x128xf32>
    %c0_56 = arith.constant 0 : index
    %c0_57 = arith.constant 0 : index
    %129 = vector.load %arg2[%c0_56, %c0_57] : memref<128x512xbf16, #tpu.memory_space<vmem>>, vector<128x128xbf16>
    %cst_58 = arith.constant dense<0.000000e+00> : vector<8x128xf32>
    %130 = tpu.matmul %126, %129, %cst_58 {dimension_numbers = #tpu.dot_dimension_numbers<[1], [0], [0], [1], [0, 0, 1, 1], [], []>} : vector<8x128xbf16>, vector<128x128xbf16>, vector<8x128xf32> -> vector<8x128xf32>
    %131 = arith.addf %128, %130 : vector<8x128xf32>
    %132 = arith.negf %131 : vector<8x128xf32>
    %133 = math.exp %132 : vector<8x128xf32>
    %cst_59 = arith.constant 1.000000e+00 : f32
    %134 = vector.broadcast %cst_59 : f32 to vector<8x128xf32>
    %135 = arith.addf %134, %133 : vector<8x128xf32>
    %136 = arith.divf %134, %135 : vector<8x128xf32>
    %137 = vector.extract_strided_slice %127 {offsets = [0, 128], sizes = [8, 128], strides = [1, 1]} : vector<8x512xf32> to vector<8x128xf32>
    %c0_60 = arith.constant 0 : index
    %c128_61 = arith.constant 128 : index
    %138 = vector.load %arg2[%c0_60, %c128_61] : memref<128x512xbf16, #tpu.memory_space<vmem>>, vector<128x128xbf16>
    %cst_62 = arith.constant dense<0.000000e+00> : vector<8x128xf32>
    %139 = tpu.matmul %126, %138, %cst_62 {dimension_numbers = #tpu.dot_dimension_numbers<[1], [0], [0], [1], [0, 0, 1, 1], [], []>} : vector<8x128xbf16>, vector<128x128xbf16>, vector<8x128xf32> -> vector<8x128xf32>
    %140 = arith.addf %137, %139 : vector<8x128xf32>
    %141 = arith.negf %140 : vector<8x128xf32>
    %142 = math.exp %141 : vector<8x128xf32>
    %cst_63 = arith.constant 1.000000e+00 : f32
    %143 = vector.broadcast %cst_63 : f32 to vector<8x128xf32>
    %144 = arith.addf %143, %142 : vector<8x128xf32>
    %145 = arith.divf %143, %144 : vector<8x128xf32>
    %146 = vector.extract_strided_slice %127 {offsets = [0, 256], sizes = [8, 128], strides = [1, 1]} : vector<8x512xf32> to vector<8x128xf32>
    %c0_64 = arith.constant 0 : index
    %c256_65 = arith.constant 256 : index
    %147 = vector.load %arg2[%c0_64, %c256_65] : memref<128x512xbf16, #tpu.memory_space<vmem>>, vector<128x128xbf16>
    %cst_66 = arith.constant dense<0.000000e+00> : vector<8x128xf32>
    %148 = tpu.matmul %126, %147, %cst_66 {dimension_numbers = #tpu.dot_dimension_numbers<[1], [0], [0], [1], [0, 0, 1, 1], [], []>} : vector<8x128xbf16>, vector<128x128xbf16>, vector<8x128xf32> -> vector<8x128xf32>
    %149 = arith.addf %146, %148 : vector<8x128xf32>
    %150 = arith.negf %149 : vector<8x128xf32>
    %151 = math.exp %150 : vector<8x128xf32>
    %cst_67 = arith.constant 1.000000e+00 : f32
    %152 = vector.broadcast %cst_67 : f32 to vector<8x128xf32>
    %153 = arith.addf %152, %151 : vector<8x128xf32>
    %154 = arith.divf %152, %153 : vector<8x128xf32>
    %155 = vector.extract_strided_slice %127 {offsets = [0, 384], sizes = [8, 128], strides = [1, 1]} : vector<8x512xf32> to vector<8x128xf32>
    %c0_68 = arith.constant 0 : index
    %c384_69 = arith.constant 384 : index
    %156 = vector.load %arg2[%c0_68, %c384_69] : memref<128x512xbf16, #tpu.memory_space<vmem>>, vector<128x128xbf16>
    %cst_70 = arith.constant dense<0.000000e+00> : vector<8x128xf32>
    %157 = tpu.matmul %126, %156, %cst_70 {dimension_numbers = #tpu.dot_dimension_numbers<[1], [0], [0], [1], [0, 0, 1, 1], [], []>} : vector<8x128xbf16>, vector<128x128xbf16>, vector<8x128xf32> -> vector<8x128xf32>
    %158 = arith.addf %155, %157 : vector<8x128xf32>
    %159 = math.tanh %158 : vector<8x128xf32>
    %160 = arith.mulf %145, %123 : vector<8x128xf32>
    %161 = arith.mulf %136, %159 : vector<8x128xf32>
    %162 = arith.addf %160, %161 : vector<8x128xf32>
    %163 = math.tanh %162 : vector<8x128xf32>
    %164 = arith.mulf %154, %163 : vector<8x128xf32>
    %165 = arith.truncf %164 : vector<8x128xf32> to vector<8x128xbf16>
    %c32 = arith.constant 32 : index
    %c0_71 = arith.constant 0 : index
    %166 = vector.load %arg7[%c32, %c0_71] : memref<64x512xf32, #tpu.memory_space<vmem>>, vector<8x512xf32>
    %167 = vector.extract_strided_slice %166 {offsets = [0, 0], sizes = [8, 128], strides = [1, 1]} : vector<8x512xf32> to vector<8x128xf32>
    %c0_72 = arith.constant 0 : index
    %c0_73 = arith.constant 0 : index
    %168 = vector.load %arg2[%c0_72, %c0_73] : memref<128x512xbf16, #tpu.memory_space<vmem>>, vector<128x128xbf16>
    %cst_74 = arith.constant dense<0.000000e+00> : vector<8x128xf32>
    %169 = tpu.matmul %165, %168, %cst_74 {dimension_numbers = #tpu.dot_dimension_numbers<[1], [0], [0], [1], [0, 0, 1, 1], [], []>} : vector<8x128xbf16>, vector<128x128xbf16>, vector<8x128xf32> -> vector<8x128xf32>
    %170 = arith.addf %167, %169 : vector<8x128xf32>
    %171 = arith.negf %170 : vector<8x128xf32>
    %172 = math.exp %171 : vector<8x128xf32>
    %cst_75 = arith.constant 1.000000e+00 : f32
    %173 = vector.broadcast %cst_75 : f32 to vector<8x128xf32>
    %174 = arith.addf %173, %172 : vector<8x128xf32>
    %175 = arith.divf %173, %174 : vector<8x128xf32>
    %176 = vector.extract_strided_slice %166 {offsets = [0, 128], sizes = [8, 128], strides = [1, 1]} : vector<8x512xf32> to vector<8x128xf32>
    %c0_76 = arith.constant 0 : index
    %c128_77 = arith.constant 128 : index
    %177 = vector.load %arg2[%c0_76, %c128_77] : memref<128x512xbf16, #tpu.memory_space<vmem>>, vector<128x128xbf16>
    %cst_78 = arith.constant dense<0.000000e+00> : vector<8x128xf32>
    %178 = tpu.matmul %165, %177, %cst_78 {dimension_numbers = #tpu.dot_dimension_numbers<[1], [0], [0], [1], [0, 0, 1, 1], [], []>} : vector<8x128xbf16>, vector<128x128xbf16>, vector<8x128xf32> -> vector<8x128xf32>
    %179 = arith.addf %176, %178 : vector<8x128xf32>
    %180 = arith.negf %179 : vector<8x128xf32>
    %181 = math.exp %180 : vector<8x128xf32>
    %cst_79 = arith.constant 1.000000e+00 : f32
    %182 = vector.broadcast %cst_79 : f32 to vector<8x128xf32>
    %183 = arith.addf %182, %181 : vector<8x128xf32>
    %184 = arith.divf %182, %183 : vector<8x128xf32>
    %185 = vector.extract_strided_slice %166 {offsets = [0, 256], sizes = [8, 128], strides = [1, 1]} : vector<8x512xf32> to vector<8x128xf32>
    %c0_80 = arith.constant 0 : index
    %c256_81 = arith.constant 256 : index
    %186 = vector.load %arg2[%c0_80, %c256_81] : memref<128x512xbf16, #tpu.memory_space<vmem>>, vector<128x128xbf16>
    %cst_82 = arith.constant dense<0.000000e+00> : vector<8x128xf32>
    %187 = tpu.matmul %165, %186, %cst_82 {dimension_numbers = #tpu.dot_dimension_numbers<[1], [0], [0], [1], [0, 0, 1, 1], [], []>} : vector<8x128xbf16>, vector<128x128xbf16>, vector<8x128xf32> -> vector<8x128xf32>
    %188 = arith.addf %185, %187 : vector<8x128xf32>
    %189 = arith.negf %188 : vector<8x128xf32>
    %190 = math.exp %189 : vector<8x128xf32>
    %cst_83 = arith.constant 1.000000e+00 : f32
    %191 = vector.broadcast %cst_83 : f32 to vector<8x128xf32>
    %192 = arith.addf %191, %190 : vector<8x128xf32>
    %193 = arith.divf %191, %192 : vector<8x128xf32>
    %194 = vector.extract_strided_slice %166 {offsets = [0, 384], sizes = [8, 128], strides = [1, 1]} : vector<8x512xf32> to vector<8x128xf32>
    %c0_84 = arith.constant 0 : index
    %c384_85 = arith.constant 384 : index
    %195 = vector.load %arg2[%c0_84, %c384_85] : memref<128x512xbf16, #tpu.memory_space<vmem>>, vector<128x128xbf16>
    %cst_86 = arith.constant dense<0.000000e+00> : vector<8x128xf32>
    %196 = tpu.matmul %165, %195, %cst_86 {dimension_numbers = #tpu.dot_dimension_numbers<[1], [0], [0], [1], [0, 0, 1, 1], [], []>} : vector<8x128xbf16>, vector<128x128xbf16>, vector<8x128xf32> -> vector<8x128xf32>
    %197 = arith.addf %194, %196 : vector<8x128xf32>
    %198 = math.tanh %197 : vector<8x128xf32>
    %199 = arith.mulf %184, %162 : vector<8x128xf32>
    %200 = arith.mulf %175, %198 : vector<8x128xf32>
    %201 = arith.addf %199, %200 : vector<8x128xf32>
    %202 = math.tanh %201 : vector<8x128xf32>
    %203 = arith.mulf %193, %202 : vector<8x128xf32>
    %204 = arith.truncf %203 : vector<8x128xf32> to vector<8x128xbf16>
    %c40 = arith.constant 40 : index
    %c0_87 = arith.constant 0 : index
    %205 = vector.load %arg7[%c40, %c0_87] : memref<64x512xf32, #tpu.memory_space<vmem>>, vector<8x512xf32>
    %206 = vector.extract_strided_slice %205 {offsets = [0, 0], sizes = [8, 128], strides = [1, 1]} : vector<8x512xf32> to vector<8x128xf32>
    %c0_88 = arith.constant 0 : index
    %c0_89 = arith.constant 0 : index
    %207 = vector.load %arg2[%c0_88, %c0_89] : memref<128x512xbf16, #tpu.memory_space<vmem>>, vector<128x128xbf16>
    %cst_90 = arith.constant dense<0.000000e+00> : vector<8x128xf32>
    %208 = tpu.matmul %204, %207, %cst_90 {dimension_numbers = #tpu.dot_dimension_numbers<[1], [0], [0], [1], [0, 0, 1, 1], [], []>} : vector<8x128xbf16>, vector<128x128xbf16>, vector<8x128xf32> -> vector<8x128xf32>
    %209 = arith.addf %206, %208 : vector<8x128xf32>
    %210 = arith.negf %209 : vector<8x128xf32>
    %211 = math.exp %210 : vector<8x128xf32>
    %cst_91 = arith.constant 1.000000e+00 : f32
    %212 = vector.broadcast %cst_91 : f32 to vector<8x128xf32>
    %213 = arith.addf %212, %211 : vector<8x128xf32>
    %214 = arith.divf %212, %213 : vector<8x128xf32>
    %215 = vector.extract_strided_slice %205 {offsets = [0, 128], sizes = [8, 128], strides = [1, 1]} : vector<8x512xf32> to vector<8x128xf32>
    %c0_92 = arith.constant 0 : index
    %c128_93 = arith.constant 128 : index
    %216 = vector.load %arg2[%c0_92, %c128_93] : memref<128x512xbf16, #tpu.memory_space<vmem>>, vector<128x128xbf16>
    %cst_94 = arith.constant dense<0.000000e+00> : vector<8x128xf32>
    %217 = tpu.matmul %204, %216, %cst_94 {dimension_numbers = #tpu.dot_dimension_numbers<[1], [0], [0], [1], [0, 0, 1, 1], [], []>} : vector<8x128xbf16>, vector<128x128xbf16>, vector<8x128xf32> -> vector<8x128xf32>
    %218 = arith.addf %215, %217 : vector<8x128xf32>
    %219 = arith.negf %218 : vector<8x128xf32>
    %220 = math.exp %219 : vector<8x128xf32>
    %cst_95 = arith.constant 1.000000e+00 : f32
    %221 = vector.broadcast %cst_95 : f32 to vector<8x128xf32>
    %222 = arith.addf %221, %220 : vector<8x128xf32>
    %223 = arith.divf %221, %222 : vector<8x128xf32>
    %224 = vector.extract_strided_slice %205 {offsets = [0, 256], sizes = [8, 128], strides = [1, 1]} : vector<8x512xf32> to vector<8x128xf32>
    %c0_96 = arith.constant 0 : index
    %c256_97 = arith.constant 256 : index
    %225 = vector.load %arg2[%c0_96, %c256_97] : memref<128x512xbf16, #tpu.memory_space<vmem>>, vector<128x128xbf16>
    %cst_98 = arith.constant dense<0.000000e+00> : vector<8x128xf32>
    %226 = tpu.matmul %204, %225, %cst_98 {dimension_numbers = #tpu.dot_dimension_numbers<[1], [0], [0], [1], [0, 0, 1, 1], [], []>} : vector<8x128xbf16>, vector<128x128xbf16>, vector<8x128xf32> -> vector<8x128xf32>
    %227 = arith.addf %224, %226 : vector<8x128xf32>
    %228 = arith.negf %227 : vector<8x128xf32>
    %229 = math.exp %228 : vector<8x128xf32>
    %cst_99 = arith.constant 1.000000e+00 : f32
    %230 = vector.broadcast %cst_99 : f32 to vector<8x128xf32>
    %231 = arith.addf %230, %229 : vector<8x128xf32>
    %232 = arith.divf %230, %231 : vector<8x128xf32>
    %233 = vector.extract_strided_slice %205 {offsets = [0, 384], sizes = [8, 128], strides = [1, 1]} : vector<8x512xf32> to vector<8x128xf32>
    %c0_100 = arith.constant 0 : index
    %c384_101 = arith.constant 384 : index
    %234 = vector.load %arg2[%c0_100, %c384_101] : memref<128x512xbf16, #tpu.memory_space<vmem>>, vector<128x128xbf16>
    %cst_102 = arith.constant dense<0.000000e+00> : vector<8x128xf32>
    %235 = tpu.matmul %204, %234, %cst_102 {dimension_numbers = #tpu.dot_dimension_numbers<[1], [0], [0], [1], [0, 0, 1, 1], [], []>} : vector<8x128xbf16>, vector<128x128xbf16>, vector<8x128xf32> -> vector<8x128xf32>
    %236 = arith.addf %233, %235 : vector<8x128xf32>
    %237 = math.tanh %236 : vector<8x128xf32>
    %238 = arith.mulf %223, %201 : vector<8x128xf32>
    %239 = arith.mulf %214, %237 : vector<8x128xf32>
    %240 = arith.addf %238, %239 : vector<8x128xf32>
    %241 = math.tanh %240 : vector<8x128xf32>
    %242 = arith.mulf %232, %241 : vector<8x128xf32>
    %243 = arith.truncf %242 : vector<8x128xf32> to vector<8x128xbf16>
    %c48 = arith.constant 48 : index
    %c0_103 = arith.constant 0 : index
    %244 = vector.load %arg7[%c48, %c0_103] : memref<64x512xf32, #tpu.memory_space<vmem>>, vector<8x512xf32>
    %245 = vector.extract_strided_slice %244 {offsets = [0, 0], sizes = [8, 128], strides = [1, 1]} : vector<8x512xf32> to vector<8x128xf32>
    %c0_104 = arith.constant 0 : index
    %c0_105 = arith.constant 0 : index
    %246 = vector.load %arg2[%c0_104, %c0_105] : memref<128x512xbf16, #tpu.memory_space<vmem>>, vector<128x128xbf16>
    %cst_106 = arith.constant dense<0.000000e+00> : vector<8x128xf32>
    %247 = tpu.matmul %243, %246, %cst_106 {dimension_numbers = #tpu.dot_dimension_numbers<[1], [0], [0], [1], [0, 0, 1, 1], [], []>} : vector<8x128xbf16>, vector<128x128xbf16>, vector<8x128xf32> -> vector<8x128xf32>
    %248 = arith.addf %245, %247 : vector<8x128xf32>
    %249 = arith.negf %248 : vector<8x128xf32>
    %250 = math.exp %249 : vector<8x128xf32>
    %cst_107 = arith.constant 1.000000e+00 : f32
    %251 = vector.broadcast %cst_107 : f32 to vector<8x128xf32>
    %252 = arith.addf %251, %250 : vector<8x128xf32>
    %253 = arith.divf %251, %252 : vector<8x128xf32>
    %254 = vector.extract_strided_slice %244 {offsets = [0, 128], sizes = [8, 128], strides = [1, 1]} : vector<8x512xf32> to vector<8x128xf32>
    %c0_108 = arith.constant 0 : index
    %c128_109 = arith.constant 128 : index
    %255 = vector.load %arg2[%c0_108, %c128_109] : memref<128x512xbf16, #tpu.memory_space<vmem>>, vector<128x128xbf16>
    %cst_110 = arith.constant dense<0.000000e+00> : vector<8x128xf32>
    %256 = tpu.matmul %243, %255, %cst_110 {dimension_numbers = #tpu.dot_dimension_numbers<[1], [0], [0], [1], [0, 0, 1, 1], [], []>} : vector<8x128xbf16>, vector<128x128xbf16>, vector<8x128xf32> -> vector<8x128xf32>
    %257 = arith.addf %254, %256 : vector<8x128xf32>
    %258 = arith.negf %257 : vector<8x128xf32>
    %259 = math.exp %258 : vector<8x128xf32>
    %cst_111 = arith.constant 1.000000e+00 : f32
    %260 = vector.broadcast %cst_111 : f32 to vector<8x128xf32>
    %261 = arith.addf %260, %259 : vector<8x128xf32>
    %262 = arith.divf %260, %261 : vector<8x128xf32>
    %263 = vector.extract_strided_slice %244 {offsets = [0, 256], sizes = [8, 128], strides = [1, 1]} : vector<8x512xf32> to vector<8x128xf32>
    %c0_112 = arith.constant 0 : index
    %c256_113 = arith.constant 256 : index
    %264 = vector.load %arg2[%c0_112, %c256_113] : memref<128x512xbf16, #tpu.memory_space<vmem>>, vector<128x128xbf16>
    %cst_114 = arith.constant dense<0.000000e+00> : vector<8x128xf32>
    %265 = tpu.matmul %243, %264, %cst_114 {dimension_numbers = #tpu.dot_dimension_numbers<[1], [0], [0], [1], [0, 0, 1, 1], [], []>} : vector<8x128xbf16>, vector<128x128xbf16>, vector<8x128xf32> -> vector<8x128xf32>
    %266 = arith.addf %263, %265 : vector<8x128xf32>
    %267 = arith.negf %266 : vector<8x128xf32>
    %268 = math.exp %267 : vector<8x128xf32>
    %cst_115 = arith.constant 1.000000e+00 : f32
    %269 = vector.broadcast %cst_115 : f32 to vector<8x128xf32>
    %270 = arith.addf %269, %268 : vector<8x128xf32>
    %271 = arith.divf %269, %270 : vector<8x128xf32>
    %272 = vector.extract_strided_slice %244 {offsets = [0, 384], sizes = [8, 128], strides = [1, 1]} : vector<8x512xf32> to vector<8x128xf32>
    %c0_116 = arith.constant 0 : index
    %c384_117 = arith.constant 384 : index
    %273 = vector.load %arg2[%c0_116, %c384_117] : memref<128x512xbf16, #tpu.memory_space<vmem>>, vector<128x128xbf16>
    %cst_118 = arith.constant dense<0.000000e+00> : vector<8x128xf32>
    %274 = tpu.matmul %243, %273, %cst_118 {dimension_numbers = #tpu.dot_dimension_numbers<[1], [0], [0], [1], [0, 0, 1, 1], [], []>} : vector<8x128xbf16>, vector<128x128xbf16>, vector<8x128xf32> -> vector<8x128xf32>
    %275 = arith.addf %272, %274 : vector<8x128xf32>
    %276 = math.tanh %275 : vector<8x128xf32>
    %277 = arith.mulf %262, %240 : vector<8x128xf32>
    %278 = arith.mulf %253, %276 : vector<8x128xf32>
    %279 = arith.addf %277, %278 : vector<8x128xf32>
    %280 = math.tanh %279 : vector<8x128xf32>
    %281 = arith.mulf %271, %280 : vector<8x128xf32>
    %282 = arith.truncf %281 : vector<8x128xf32> to vector<8x128xbf16>
    %c56 = arith.constant 56 : index
    %c0_119 = arith.constant 0 : index
    %283 = vector.load %arg7[%c56, %c0_119] : memref<64x512xf32, #tpu.memory_space<vmem>>, vector<8x512xf32>
    %284 = vector.extract_strided_slice %283 {offsets = [0, 0], sizes = [8, 128], strides = [1, 1]} : vector<8x512xf32> to vector<8x128xf32>
    %c0_120 = arith.constant 0 : index
    %c0_121 = arith.constant 0 : index
    %285 = vector.load %arg2[%c0_120, %c0_121] : memref<128x512xbf16, #tpu.memory_space<vmem>>, vector<128x128xbf16>
    %cst_122 = arith.constant dense<0.000000e+00> : vector<8x128xf32>
    %286 = tpu.matmul %282, %285, %cst_122 {dimension_numbers = #tpu.dot_dimension_numbers<[1], [0], [0], [1], [0, 0, 1, 1], [], []>} : vector<8x128xbf16>, vector<128x128xbf16>, vector<8x128xf32> -> vector<8x128xf32>
    %287 = arith.addf %284, %286 : vector<8x128xf32>
    %288 = arith.negf %287 : vector<8x128xf32>
    %289 = math.exp %288 : vector<8x128xf32>
    %cst_123 = arith.constant 1.000000e+00 : f32
    %290 = vector.broadcast %cst_123 : f32 to vector<8x128xf32>
    %291 = arith.addf %290, %289 : vector<8x128xf32>
    %292 = arith.divf %290, %291 : vector<8x128xf32>
    %293 = vector.extract_strided_slice %283 {offsets = [0, 128], sizes = [8, 128], strides = [1, 1]} : vector<8x512xf32> to vector<8x128xf32>
    %c0_124 = arith.constant 0 : index
    %c128_125 = arith.constant 128 : index
    %294 = vector.load %arg2[%c0_124, %c128_125] : memref<128x512xbf16, #tpu.memory_space<vmem>>, vector<128x128xbf16>
    %cst_126 = arith.constant dense<0.000000e+00> : vector<8x128xf32>
    %295 = tpu.matmul %282, %294, %cst_126 {dimension_numbers = #tpu.dot_dimension_numbers<[1], [0], [0], [1], [0, 0, 1, 1], [], []>} : vector<8x128xbf16>, vector<128x128xbf16>, vector<8x128xf32> -> vector<8x128xf32>
    %296 = arith.addf %293, %295 : vector<8x128xf32>
    %297 = arith.negf %296 : vector<8x128xf32>
    %298 = math.exp %297 : vector<8x128xf32>
    %cst_127 = arith.constant 1.000000e+00 : f32
    %299 = vector.broadcast %cst_127 : f32 to vector<8x128xf32>
    %300 = arith.addf %299, %298 : vector<8x128xf32>
    %301 = arith.divf %299, %300 : vector<8x128xf32>
    %302 = vector.extract_strided_slice %283 {offsets = [0, 256], sizes = [8, 128], strides = [1, 1]} : vector<8x512xf32> to vector<8x128xf32>
    %c0_128 = arith.constant 0 : index
    %c256_129 = arith.constant 256 : index
    %303 = vector.load %arg2[%c0_128, %c256_129] : memref<128x512xbf16, #tpu.memory_space<vmem>>, vector<128x128xbf16>
    %cst_130 = arith.constant dense<0.000000e+00> : vector<8x128xf32>
    %304 = tpu.matmul %282, %303, %cst_130 {dimension_numbers = #tpu.dot_dimension_numbers<[1], [0], [0], [1], [0, 0, 1, 1], [], []>} : vector<8x128xbf16>, vector<128x128xbf16>, vector<8x128xf32> -> vector<8x128xf32>
    %305 = arith.addf %302, %304 : vector<8x128xf32>
    %306 = arith.negf %305 : vector<8x128xf32>
    %307 = math.exp %306 : vector<8x128xf32>
    %cst_131 = arith.constant 1.000000e+00 : f32
    %308 = vector.broadcast %cst_131 : f32 to vector<8x128xf32>
    %309 = arith.addf %308, %307 : vector<8x128xf32>
    %310 = arith.divf %308, %309 : vector<8x128xf32>
    %311 = vector.extract_strided_slice %283 {offsets = [0, 384], sizes = [8, 128], strides = [1, 1]} : vector<8x512xf32> to vector<8x128xf32>
    %c0_132 = arith.constant 0 : index
    %c384_133 = arith.constant 384 : index
    %312 = vector.load %arg2[%c0_132, %c384_133] : memref<128x512xbf16, #tpu.memory_space<vmem>>, vector<128x128xbf16>
    %cst_134 = arith.constant dense<0.000000e+00> : vector<8x128xf32>
    %313 = tpu.matmul %282, %312, %cst_134 {dimension_numbers = #tpu.dot_dimension_numbers<[1], [0], [0], [1], [0, 0, 1, 1], [], []>} : vector<8x128xbf16>, vector<128x128xbf16>, vector<8x128xf32> -> vector<8x128xf32>
    %314 = arith.addf %311, %313 : vector<8x128xf32>
    %315 = math.tanh %314 : vector<8x128xf32>
    %316 = arith.mulf %301, %279 : vector<8x128xf32>
    %317 = arith.mulf %292, %315 : vector<8x128xf32>
    %318 = arith.addf %316, %317 : vector<8x128xf32>
    %319 = math.tanh %318 : vector<8x128xf32>
    %320 = arith.mulf %310, %319 : vector<8x128xf32>
    %321 = arith.truncf %320 : vector<8x128xf32> to vector<8x128xbf16>
    %c0_135 = arith.constant 0 : index
    %c0_136 = arith.constant 0 : index
    %322 = vector.load %arg4[%c0_135, %c0_136] : memref<128x6xbf16, #tpu.memory_space<vmem>>, vector<128x6xbf16>
    %cst_137 = arith.constant dense<0.000000e+00> : vector<8x6xf32>
    %323 = tpu.matmul %321, %322, %cst_137 {dimension_numbers = #tpu.dot_dimension_numbers<[1], [0], [0], [1], [0, 0, 1, 1], [], []>} : vector<8x128xbf16>, vector<128x6xbf16>, vector<8x6xf32> -> vector<8x6xf32>
    %c0_138 = arith.constant 0 : index
    %c0_139 = arith.constant 0 : index
    %324 = vector.load %arg5[%c0_138, %c0_139] : memref<1x6xf32, #tpu.memory_space<vmem>>, vector<1x6xf32>
    %325 = vector.broadcast %324 : vector<1x6xf32> to vector<8x6xf32>
    %326 = arith.addf %323, %325 : vector<8x6xf32>
    %cst_140 = arith.constant dense<0xFF800000> : vector<8xf32>
    %327 = vector.multi_reduction <maximumf>, %326, %cst_140 [1] : vector<8x6xf32> to vector<8xf32>
    %328 = vector.shape_cast %327 : vector<8xf32> to vector<8x1xf32>
    %329 = vector.broadcast %328 : vector<8x1xf32> to vector<8x6xf32>
    %330 = arith.subf %326, %329 : vector<8x6xf32>
    %331 = math.exp %330 : vector<8x6xf32>
    %cst_141 = arith.constant dense<0.000000e+00> : vector<8xf32>
    %332 = vector.multi_reduction <add>, %331, %cst_141 [1] : vector<8x6xf32> to vector<8xf32>
    %333 = vector.shape_cast %332 : vector<8xf32> to vector<8x1xf32>
    %334 = tpu.reciprocal %333 {approx = true} : vector<8x1xf32> -> vector<8x1xf32>
    %335 = vector.broadcast %334 : vector<8x1xf32> to vector<8x6xf32>
    %336 = arith.mulf %331, %335 : vector<8x6xf32>
    %c0_142 = arith.constant 0 : index
    %c0_143 = arith.constant 0 : index
    %337 = vector.load %arg6[%c0_142, %c0_143] : memref<8x6xf32, #tpu.memory_space<vmem>>, vector<8x6xf32>
    tpu.vector_store %arg6[%c0_142, %c0_143], %336 {strides = array<i32>} : memref<8x6xf32, #tpu.memory_space<vmem>>, vector<8x6xf32>,
    return
  }
}

</mosaic_0001>

<bundles_post_ra>
// kernel: lstm_forward.1
= control target key start
LH: loop header
LB: loop body
LE: loop exit
PB: predicated region body
PF: predicated region fallthrough
CT: control target
= control target key end

     0   :  { %11 = vsyncpa [#allocation4], 0  ;;  %s2680_s0 = inlined_call_operand.vmem [shape: bf16[64,6], index: 0, kind: input, shape index: {}]   ;;  %s2681_s1 = inlined_call_operand.vmem [shape: bf16[6,512], index: 1, kind: input, shape index: {}]   ;;  %s2682_s2 = inlined_call_operand.hbm [shape: bf16[128,512], index: 2, kind: input, shape index: {}]   ;;  %s2683_s3 = inlined_call_operand.vmem [shape: f32[1,512], index: 3, kind: input, shape index: {}]   ;;  %s2684_s4 = inlined_call_operand.vmem [shape: bf16[128,6], index: 4, kind: input, shape index: {}]   ;;  %s2685_s5 = inlined_call_operand.vmem [shape: f32[1,6], index: 5, kind: input, shape index: {}]   ;;  %s2686_s6 = inlined_call_operand.hbm [shape: f32[8,6], index: 6, kind: output, shape index: {}]  }
   0x1   :  { %12 = vsyncpa [#allocation5], 0  ;;  %s21_s23 = sshll.u32 %s2682_s2, 4  ;;  %s2074_s24 = smov [#allocation3]   ;;  %s22_s23 = int_to_ptr.hbm [resolvable:$true] %s21_s23 }
   0x2   :  { %s23_s25 = sshll.u32 %s2074_s24, 4  ;;  %s2075_s26 = smov 256   ;;  %s24_s25 = int_to_ptr.vmem [resolvable:$true] %s23_s25 }
   0x3   :  { %s2076_s27 = smov 16  }
   0x4   :  { %29 = dma.hbm_to_vmem [thread:$0]  %s22_s23, 4096, %s24_s25, [#allocation4], %s2075_s26, %s2075_s26, %s2076_s27  }
   0x5   :  { %2070 = dma.done.wait [#allocation4], 4096  }
   0x6   :  { %2071 = vsyncadd [#allocation4], 4294963200  ;;  %v49_v0 = vld [vmem:[%s2681_s1] sm:$0x77]  ;;  %v50_v1 = vld [vmem:[%s2681_s1 + $0x8] sm:$0x77] }
   0x7   :  { %v83_v2 = vunpack.c.l.b16 %v49_v0  ;;  %v85_v3 = vunpack.c.l.b16 %v50_v1  ;;  %v86_v4 = vunpack.c.h.b16 %v50_v1  ;;  %v84_v5 = vunpack.c.h.b16 %v49_v0  ;;  %v1685_v6 = vld [vmem:[#allocation3 + $0xe0] sm:$0xf]  ;;  %v1850_v7 = vld [vmem:[#allocation3 + $0xec] sm:$0xf0]  ;;  %v2131_v12 = vld [vmem:[%s2680_s0 + $0x18] sm:$0xff]  ;;  %s2078_s7 = smov [#allocation6]  }
   0x8   :  { %vm104_vm0 = vcmask 1042432   ;;  %v2126_v11 = vld [vmem:[%s2680_s0] sm:$0xff]  ;;  %v1858_v15 = vld [vmem:[#allocation3 + $0xf0] sm:$0xf0]  ;;  %v2133_v16 = vor.u32 %v1850_v7, %v1685_v6  ;;  %v1751_v18 = vld [vmem:[#allocation3 + $0xe8] sm:$0xf] }
   0x9   :  { %v87_v8 = vpack.c.b16 %v83_v2, %v83_v2  ;;  %v89_v9 = vpack.c.b16 %v85_v3, %v85_v3  ;;  %v90_v10 = vpack.c.b16 %v86_v4, %v86_v4  ;;  %v88_v13 = vpack.c.b16 %v84_v5, %v84_v5  ;;  %v1718_v14 = vld [vmem:[#allocation3 + $0xe4] sm:$0xf]  ;;  %v1681_v17 = vld [vmem:[#allocation3 + $0xc0] sm:$0xf]  ;;  %v1866_v19 = vld [vmem:[#allocation3 + $0xf4] sm:$0xf0] }
   0xa   :  { %v1849_v24 = vld [vmem:[#allocation3 + $0xcc] sm:$0xf0]  ;;  %vm91_vm1 = vcmask 48128   ;;  %v2139_v25 = vor.u32 %v1858_v15, %v1718_v14  ;;  %v2141_v26 = vor.u32 %v1866_v19, %v1751_v18  ;;  %v1714_v27 = vld [vmem:[#allocation3 + $0xc4] sm:$0xf]  ;;  %v2195_v3 = vld [vmem:[%s2680_s0 + $0x8] sm:$0xff] }
   0xb   :  { %v106_v20 = vsel %vm104_vm0, %v87_v8, 0  ;;  %v112_v21 = vsel %vm104_vm0, %v89_v9, 0  ;;  %v115_v22 = vsel %vm104_vm0, %v90_v10, 0  ;;  %v109_v23 = vsel %vm104_vm0, %v88_v13, 0  ;;  %v1857_v28 = vld [vmem:[#allocation3 + $0xd0] sm:$0xf0] }
   0xc   :  { %124 = vmatpush.bf16.msra.mxu0 %v106_v20  ;;  %1883 = vmatpush.bf16.msra.mxu1 %v106_v20  ;;  %v1784_v29 = vld [vmem:[#allocation3 + $0xec] sm:$0xf]  ;;  %v2144_v30 = vor.u32 %v1849_v24, %v1681_v17  ;;  %v1747_v31 = vld [vmem:[#allocation3 + $0xc8] sm:$0xf]  ;;  %v1865_v32 = vld [vmem:[#allocation3 + $0xd4] sm:$0xf0]  ;;  %v2158_v37 = vor.u32 %v1857_v28, %v1714_v27 }
   0xd   :  { %182 = vmatpush.bf16.msra.mxu2 %v112_v21  ;;  %211 = vmatpush.bf16.msra.mxu3 %v115_v22  ;;  %v1874_v33 = vld [vmem:[#allocation3 + $0xf8] sm:$0xf0]  ;;  %v1677_v34 = vld [vmem:[#allocation3 + $0xa0] sm:$0xf]  ;;  %v1848_v35 = vld [vmem:[#allocation3 + $0xac] sm:$0xf0]  ;;  %v2160_v38 = vor.u32 %v1865_v32, %v1747_v31 }
   0xe   :  { %v2150_v36 = vor.u32 %v1874_v33, %v1784_v29  ;;  %v1710_v39 = vld [vmem:[#allocation3 + $0xa4] sm:$0xf]  ;;  %v1856_v40 = vld [vmem:[#allocation3 + $0xb0] sm:$0xf0]  ;;  %v1743_v41 = vld [vmem:[#allocation3 + $0xa8] sm:$0xf]  ;;  %v2163_v42 = vor.u32 %v1848_v35, %v1677_v34 }
   0xf   :  { %1639 = vmatmul.msk.bf16.vlgmr.msra.gmra.mxu0 %vm91_vm1, %v2126_v11  ;;  %1642 = vmatmul.msk.bf16.vlgmr.msra.gmra.mxu1 %vm91_vm1, %v2131_v12  ;;  %v1864_v43 = vld [vmem:[#allocation3 + $0xb4] sm:$0xf0]  ;;  %v1780_v44 = vld [vmem:[#allocation3 + $0xcc] sm:$0xf]  ;;  %v1873_v45 = vld [vmem:[#allocation3 + $0xd8] sm:$0xf0]  ;;  %v2170_v51 = vor.u32 %v1856_v40, %v1710_v39 }
  0x10   :  { %153 = vmatpush.bf16.msrb.mxu1 %v109_v23  ;;  %333 = vmatpush.bf16.msrb.mxu0 %v2133_v16  ;;  %v1673_v46 = vld [vmem:[#allocation3 + $0x80] sm:$0xf]  ;;  %v1847_v47 = vld [vmem:[#allocation3 + $0x8c] sm:$0xf0]  ;;  %v2166_v48 = vor.u32 %v1873_v45, %v1780_v44  ;;  %v1776_v49 = vld [vmem:[#allocation3 + $0xac] sm:$0xf]  ;;  %v2172_v53 = vor.u32 %v1864_v43, %v1743_v41 }
  0x11   :  { %1647 = vmatmul.msk.bf16.vlgmr.msra.gmra.mxu2 %vm91_vm1, %v2126_v11  ;;  %1651 = vmatmul.msk.bf16.vlgmr.msra.gmra.mxu3 %vm91_vm1, %v2126_v11  ;;  %v1872_v50 = vld [vmem:[#allocation3 + $0xb8] sm:$0xf0]  ;;  %v1669_v52 = vld [vmem:[#allocation3 + $0x60] sm:$0xf]  ;;  %v1706_v54 = vld [vmem:[#allocation3 + $0x84] sm:$0xf]  ;;  %v2175_v55 = vor.u32 %v1847_v47, %v1673_v46 }
  0x12   :  { %527 = vmatpush.bf16.msrb.mxu2 %v2141_v26  ;;  %624 = vmatpush.bf16.msrb.mxu3 %v2150_v36  ;;  %v1855_v56 = vld [vmem:[#allocation3 + $0x90] sm:$0xf0]  ;;  %v2178_v57 = vor.u32 %v1872_v50, %v1776_v49  ;;  %v1739_v58 = vld [vmem:[#allocation3 + $0x88] sm:$0xf]  ;;  %v1863_v59 = vld [vmem:[#allocation3 + $0x94] sm:$0xf0] }
  0x13   :  { %v1846_v60 = vld [vmem:[#allocation3 + $0x6c] sm:$0xf0]  ;;  %v1772_v61 = vld [vmem:[#allocation3 + $0x8c] sm:$0xf]  ;;  %v1871_v62 = vld [vmem:[#allocation3 + $0x98] sm:$0xf0]  ;;  %v2182_v63 = vor.u32 %v1855_v56, %v1706_v54  ;;  %v2184_v0 = vor.u32 %v1863_v59, %v1739_v58 }
  0x14   :  { %430 = vmatpush.bf16.msra.mxu1 %v2139_v25  ;;  %334 = vmatpush.bf16.msrb.mxu0 %v2144_v30  ;;  %v2187_v1 = vor.u32 %v1846_v60, %v1669_v52  ;;  %v2190_v2 = vor.u32 %v1871_v62, %v1772_v61  ;;  %v1665_v4 = vld [vmem:[#allocation3 + $0x40] sm:$0xf]  ;;  %v1845_v5 = vld [vmem:[#allocation3 + $0x4c] sm:$0xf0]  ;;  %v1735_v7 = vld [vmem:[#allocation3 + $0x68] sm:$0xf] }
  0x15   :  { %v2200_v6 = vor.u32 %v1845_v5, %v1665_v4  ;;  %v1862_v8 = vld [vmem:[#allocation3 + $0x74] sm:$0xf0]  ;;  %v1768_v9 = vld [vmem:[#allocation3 + $0x6c] sm:$0xf]  ;;  %v1661_v10 = vld [vmem:[#allocation3 + $0x20] sm:$0xf] }
  0x16   :  { %528 = vmatpush.bf16.msrb.mxu2 %v2160_v38  ;;  %625 = vmatpush.bf16.msrb.mxu3 %v2166_v48  ;;  %v1844_v13 = vld [vmem:[#allocation3 + $0x2c] sm:$0xf0]  ;;  %v2207_v14 = vor.u32 %v1862_v8, %v1735_v7  ;;  %v1870_v15 = vld [vmem:[#allocation3 + $0x78] sm:$0xf0]  ;;  %v1702_v17 = vld [vmem:[#allocation3 + $0x64] sm:$0xf] }
  0x17   :  { %v1854_v18 = vld [vmem:[#allocation3 + $0x70] sm:$0xf0]  ;;  %v2213_v19 = vor.u32 %v1870_v15, %v1768_v9  ;;  %v1731_v20 = vld [vmem:[#allocation3 + $0x48] sm:$0xf]  ;;  %v1657_v21 = vld [vmem:[#allocation3] sm:$0xf]  ;;  %v2219_v28 = vor.u32 %v1844_v13, %v1661_v10 }
  0x18   :  { %431 = vmatpush.bf16.msra.mxu1 %v2158_v37  ;;  %335 = vmatpush.bf16.msrb.mxu0 %v2163_v42  ;;  %v1843_v22 = vld [vmem:[#allocation3 + $0xc] sm:$0xf0]  ;;  %v2215_v23 = vor.u32 %v1854_v18, %v1702_v17  ;;  %v1764_v24 = vld [vmem:[#allocation3 + $0x4c] sm:$0xf]  ;;  %v1869_v27 = vld [vmem:[#allocation3 + $0x58] sm:$0xf0] }
  0x19   :  { %v2224_v31 = vor.u32 %v1869_v27, %v1764_v24  ;;  %v1698_v32 = vld [vmem:[#allocation3 + $0x44] sm:$0xf]  ;;  %v1853_v33 = vld [vmem:[#allocation3 + $0x50] sm:$0xf0]  ;;  %v1727_v34 = vld [vmem:[#allocation3 + $0x28] sm:$0xf]  ;;  %v2233_v44 = vor.u32 %v1843_v22, %v1657_v21 }
  0x1a   :  { %529 = vmatpush.bf16.msrb.mxu2 %v2172_v53  ;;  %626 = vmatpush.bf16.msrb.mxu3 %v2178_v57  ;;  %v2227_v35 = vor.u32 %v1853_v33, %v1698_v32  ;;  %v1860_v39 = vld [vmem:[#allocation3 + $0x34] sm:$0xf0]  ;;  %v1760_v40 = vld [vmem:[#allocation3 + $0x2c] sm:$0xf]  ;;  %v1868_v41 = vld [vmem:[#allocation3 + $0x38] sm:$0xf0] }
  0x1b   :  { %v2230_v43 = vor.u32 %v1860_v39, %v1727_v34  ;;  %v2236_v45 = vor.u32 %v1868_v41, %v1760_v40  ;;  %v1723_v46 = vld [vmem:[#allocation3 + $0x8] sm:$0xf]  ;;  %v1859_v47 = vld [vmem:[#allocation3 + $0x14] sm:$0xf0]  ;;  %v1756_v49 = vld [vmem:[#allocation3 + $0xc] sm:$0xf] }
  0x1c   :  { %432 = vmatpush.bf16.msra.mxu1 %v2170_v51  ;;  %336 = vmatpush.bf16.msrb.mxu0 %v2175_v55  ;;  %v1867_v50 = vld [vmem:[#allocation3 + $0x18] sm:$0xf0]  ;;  %v2240_v52 = vor.u32 %v1859_v47, %v1723_v46  ;;  %v1841_v56 = vld [vmem:[%s2680_s0 + $0x10] sm:$0xff]  ;;  %v1694_v58 = vld [vmem:[#allocation3 + $0x24] sm:$0xf]  ;;  %s1611_s2 = sshll.u32 %s2078_s7, 4  ;;  %s1612_s2 = int_to_ptr.vmem [resolvable:$true] %s1611_s2 }
  0x1d   :  { %v2244_v54 = vor.u32 %v1867_v50, %v1756_v49  ;;  %v1852_v59 = vld [vmem:[#allocation3 + $0x30] sm:$0xf0]  ;;  %v1690_v61 = vld [vmem:[#allocation3 + $0x4] sm:$0xf]  ;;  %s1613_s9 = sshll.u32 %s2686_s6, 4  ;;  %s1614_s9 = int_to_ptr.hbm [resolvable:$true] %s1613_s9 }
  0x1e   :  { %530 = vmatpush.bf16.msrb.mxu2 %v2184_v0  ;;  %627 = vmatpush.bf16.msrb.mxu3 %v2190_v2  ;;  %v2258_v60 = vor.u32 %v1852_v59, %v1694_v58  ;;  %v1851_v62 = vld [vmem:[#allocation3 + $0x10] sm:$0xf0] }
  0x1f   :  { %1640 = vmatmul.msk.bf16.gmra.mxu0 %vm91_vm1, %v2195_v3  ;;  %1643 = vmatmul.msk.bf16.vlgmr.msrb.gmra.mxu1 %vm91_vm1, %v2126_v11  ;;  %v1861_v11 = vld [vmem:[#allocation3 + $0x54] sm:$0xf0]  ;;  %v2263_v4 = vor.u32 %v1851_v62, %v1690_v61 }
  0x20   :  { %433 = vmatpush.bf16.msra.mxu1 %v2182_v63  ;;  %337 = vmatpush.bf16.msrb.mxu0 %v2187_v1  ;;  %v2222_v29 = vor.u32 %v1861_v11, %v1731_v20 }
  0x21   :  { %1648 = vmatmul.msk.bf16.gmra.mxu2 %vm91_vm1, %v2195_v3  ;;  %1652 = vmatmul.msk.bf16.gmra.mxu3 %vm91_vm1, %v2195_v3 }
  0x22   :  { %531 = vmatpush.bf16.msrb.mxu2 %v2207_v14  ;;  %628 = vmatpush.bf16.msrb.mxu3 %v2213_v19 }
  0x24   :  { %338 = vmatpush.bf16.msrb.mxu0 %v2200_v6  ;;  %434 = vmatpush.bf16.msra.mxu1 %v2215_v23 }
  0x26   :  { %532 = vmatpush.bf16.msrb.mxu2 %v2222_v29  ;;  %629 = vmatpush.bf16.msrb.mxu3 %v2224_v31 }
  0x28   :  { %339 = vmatpush.bf16.msrb.mxu0 %v2219_v28  ;;  %435 = vmatpush.bf16.msra.mxu1 %v2227_v35 }
  0x2a   :  { %533 = vmatpush.bf16.msrb.mxu2 %v2230_v43  ;;  %630 = vmatpush.bf16.msrb.mxu3 %v2236_v45 }
  0x2c   :  { %340 = vmatpush.bf16.msrb.mxu0 %v2233_v44  ;;  %436 = vmatpush.bf16.msra.mxu1 %v2258_v60 }
  0x2e   :  { %534 = vmatpush.bf16.msrb.mxu2 %v2240_v52  ;;  %631 = vmatpush.bf16.msrb.mxu3 %v2244_v54 }
  0x2f   :  { %1641 = vmatmul.msk.bf16.gmra.mxu0 %vm91_vm1, %v1841_v56  ;;  %1644 = vmatmul.msk.bf16.gmra.mxu1 %vm91_vm1, %v2195_v3  ;;  %v2077_v3 = vmov 0  }
  0x30   :  { %649 = vmatpush.bf16.msra.mxu0 %v2133_v16  ;;  %437 = vmatpush.bf16.msra.mxu1 %v2263_v4 }
  0x31   :  { %1649 = vmatmul.msk.bf16.gmra.mxu2 %vm91_vm1, %v1841_v56  ;;  %1653 = vmatmul.msk.bf16.gmra.mxu3 %vm91_vm1, %v1841_v56 }
  0x32   :  { %715 = vmatpush.bf16.msra.mxu2 %v2141_v26  ;;  %748 = vmatpush.bf16.msra.mxu3 %v2150_v36 }
  0x34   :  { %650 = vmatpush.bf16.msra.mxu0 %v2144_v30  ;;  %682 = vmatpush.bf16.msrb.mxu1 %v2139_v25 }
  0x36   :  { %716 = vmatpush.bf16.msra.mxu2 %v2160_v38  ;;  %749 = vmatpush.bf16.msra.mxu3 %v2166_v48 }
  0x38   :  { %651 = vmatpush.bf16.msra.mxu0 %v2163_v42  ;;  %683 = vmatpush.bf16.msrb.mxu1 %v2158_v37 }
  0x3a   :  { %717 = vmatpush.bf16.msra.mxu2 %v2172_v53  ;;  %750 = vmatpush.bf16.msra.mxu3 %v2178_v57 }
  0x3c   :  { %652 = vmatpush.bf16.msra.mxu0 %v2175_v55  ;;  %684 = vmatpush.bf16.msrb.mxu1 %v2170_v51 }
  0x3e   :  { %718 = vmatpush.bf16.msra.mxu2 %v2184_v0  ;;  %751 = vmatpush.bf16.msra.mxu3 %v2190_v2 }
  0x3f   :  { %1645 = vmatmul.msk.bf16.gmra.mxu1 %vm91_vm1, %v1841_v56  ;;  %341 = vmatmul.bf16.vlgmr.msrb.gmra.mxu0 %v2077_v3 }
  0x40   :  { %653 = vmatpush.bf16.msra.mxu0 %v2187_v1  ;;  %685 = vmatpush.bf16.msrb.mxu1 %v2182_v63 }
  0x41   :  { %1650 = vmatmul.msk.bf16.gmra.mxu2 %vm91_vm1, %v2131_v12  ;;  %1654 = vmatmul.msk.bf16.gmra.mxu3 %vm91_vm1, %v2131_v12 }
  0x42   :  { %719 = vmatpush.bf16.msra.mxu2 %v2207_v14  ;;  %752 = vmatpush.bf16.msra.mxu3 %v2213_v19 }
  0x44   :  { %654 = vmatpush.bf16.msra.mxu0 %v2200_v6  ;;  %686 = vmatpush.bf16.msrb.mxu1 %v2215_v23 }
  0x46   :  { %720 = vmatpush.bf16.msra.mxu2 %v2222_v29  ;;  %753 = vmatpush.bf16.msra.mxu3 %v2224_v31 }
  0x48   :  { %655 = vmatpush.bf16.msra.mxu0 %v2219_v28  ;;  %687 = vmatpush.bf16.msrb.mxu1 %v2227_v35 }
  0x4a   :  { %721 = vmatpush.bf16.msra.mxu2 %v2230_v43  ;;  %754 = vmatpush.bf16.msra.mxu3 %v2236_v45 }
  0x4c   :  { %656 = vmatpush.bf16.msra.mxu0 %v2233_v44  ;;  %688 = vmatpush.bf16.msrb.mxu1 %v2258_v60 }
  0x4e   :  { %722 = vmatpush.bf16.msra.mxu2 %v2240_v52  ;;  %755 = vmatpush.bf16.msra.mxu3 %v2244_v54 }
  0x4f   :  { %1646 = vmatmul.msk.bf16.gmra.mxu1 %vm91_vm1, %v2131_v12  ;;  %v51_v12 = vld [vmem:[%s2683_s3] sm:$0xf] }
  0x50   :  { %773 = vmatpush.bf16.msrb.mxu0 %v2133_v16  ;;  %689 = vmatpush.bf16.msrb.mxu1 %v2263_v4  ;;  %v2336_v5 = vperm.slane %v51_v12, 0  ;;  %v2350_v20 = vperm.slane %v51_v12, 2  ;;  %v56_v21 = vperm.slane %v51_v12, 3  ;;  %v2362_v39 = vperm.slane %v51_v12, 1 }
  0x51   :  { %535 = vmatmul.bf16.vlgmr.msrb.gmra.mxu2 %v2077_v3  ;;  %632 = vmatmul.bf16.vlgmr.msrb.gmra.mxu3 %v2077_v3 }
  0x52   :  { %839 = vmatpush.bf16.msrb.mxu2 %v2141_v26  ;;  %872 = vmatpush.bf16.msrb.mxu3 %v2150_v36  ;;  %2688 = vst [vmem:[#allocation9_spill] sm:$0xff] %v2336_v5 }
  0x54   :  { %774 = vmatpush.bf16.msrb.mxu0 %v2144_v30 }
  0x56   :  { %840 = vmatpush.bf16.msrb.mxu2 %v2160_v38  ;;  %873 = vmatpush.bf16.msrb.mxu3 %v2166_v48 }
  0x58   :  { %775 = vmatpush.bf16.msrb.mxu0 %v2163_v42 }
  0x5a   :  { %841 = vmatpush.bf16.msrb.mxu2 %v2172_v53  ;;  %874 = vmatpush.bf16.msrb.mxu3 %v2178_v57 }
  0x5c   :  { %776 = vmatpush.bf16.msrb.mxu0 %v2175_v55 }
  0x5e   :  { %842 = vmatpush.bf16.msrb.mxu2 %v2184_v0  ;;  %875 = vmatpush.bf16.msrb.mxu3 %v2190_v2 }
  0x5f   :  { %438 = vmatmul.bf16.vlgmr.msra.gmra.mxu1 %v2077_v3 }
  0x60   :  { %777 = vmatpush.bf16.msrb.mxu0 %v2187_v1  ;;  %806 = vmatpush.bf16.msra.mxu1 %v2139_v25 }
  0x62   :  { %843 = vmatpush.bf16.msrb.mxu2 %v2207_v14  ;;  %876 = vmatpush.bf16.msrb.mxu3 %v2213_v19 }
  0x64   :  { %778 = vmatpush.bf16.msrb.mxu0 %v2200_v6  ;;  %807 = vmatpush.bf16.msra.mxu1 %v2158_v37 }
  0x66   :  { %844 = vmatpush.bf16.msrb.mxu2 %v2222_v29  ;;  %877 = vmatpush.bf16.msrb.mxu3 %v2224_v31 }
  0x68   :  { %779 = vmatpush.bf16.msrb.mxu0 %v2219_v28  ;;  %808 = vmatpush.bf16.msra.mxu1 %v2170_v51 }
  0x6a   :  { %845 = vmatpush.bf16.msrb.mxu2 %v2230_v43  ;;  %878 = vmatpush.bf16.msrb.mxu3 %v2236_v45 }
  0x6c   :  { %780 = vmatpush.bf16.msrb.mxu0 %v2233_v44  ;;  %809 = vmatpush.bf16.msra.mxu1 %v2182_v63 }
  0x6e   :  { %846 = vmatpush.bf16.msrb.mxu2 %v2240_v52  ;;  %879 = vmatpush.bf16.msrb.mxu3 %v2244_v54 }
  0x70   :  { %810 = vmatpush.bf16.msra.mxu1 %v2215_v23 }
  0x74   :  { %811 = vmatpush.bf16.msra.mxu1 %v2227_v35 }
  0x78   :  { %812 = vmatpush.bf16.msra.mxu1 %v2258_v60 }
  0x7c   :  { %813 = vmatpush.bf16.msra.mxu1 %v2263_v4 }
  0x8c   :  { %v126_v7 = vpop.f32.mrf.mxu0  ;;  %v141_v8 = vpop.f32.mrf.mxu1 }
  0x8d   :  { %v2339_v9 = vadd.f32 %v141_v8, %v2336_v5 }
  0x8f   :  { %2689 = vst [vmem:[#allocation10_spill] sm:$0xff] %v2339_v9 }
  0x94   :  { %v2341_v10 = vpop.f32.mrf.mxu2  ;;  %v2343_v13 = vpop.f32.mrf.mxu3 }
  0x95   :  { %v128_v15 = vpop.f32.mrf.mxu0  ;;  %v2345_v17 = vpop.f32.mrf.mxu1 }
  0x96   :  { %2690 = vst [vmem:[#allocation11_spill] sm:$0xff] %v2345_v17  ;;  %v2348_v18 = vadd.f32 %v128_v15, %v2336_v5 }
  0x9c   :  { %v186_v22 = vpop.f32.mrf.mxu2  ;;  %v215_v11 = vpop.f32.mrf.mxu3 }
  0x9d   :  { %v2353_v24 = vadd.f32 %v186_v22, %v2350_v20  ;;  %v2355_v27 = vadd.f32 %v215_v11, %v56_v21  ;;  %v131_v32 = vpop.f32.mrf.mxu0  ;;  %v2357_v33 = vpop.f32.mrf.mxu1 }
  0x9e   :  { %v2360_v34 = vadd.f32 %v131_v32, %v2336_v5 }
  0xa4   :  { %v189_v40 = vpop.f32.mrf.mxu2  ;;  %v218_v41 = vpop.f32.mrf.mxu3 }
  0xa5   :  { %v2365_v46 = vadd.f32 %v189_v40, %v2350_v20  ;;  %v2367_v47 = vadd.f32 %v218_v41, %v56_v21  ;;  %v133_v49 = vpop.f32.mrf.mxu0  ;;  %v157_v50 = vpop.f32.mrf.mxu1 }
  0xa6   :  { %v2370_v56 = vadd.f32 %v133_v49, %v2336_v5  ;;  %v2373_v58 = vadd.f32 %v157_v50, %v2362_v39 }
  0xac   :  { %v191_v59 = vpop.f32.mrf.mxu2  ;;  %v220_v61 = vpop.f32.mrf.mxu3 }
  0xad   :  { %v2376_v62 = vadd.f32 %v191_v59, %v2350_v20  ;;  %v2378_v3 = vadd.f32 %v220_v61, %v56_v21  ;;  %v136_v12 = vpop.f32.mrf.mxu0  ;;  %v160_v8 = vpop.f32.mrf.mxu1 }
  0xae   :  { %v2381_v15 = vadd.f32 %v136_v12, %v2336_v5  ;;  %v2384_v22 = vadd.f32 %v160_v8, %v2362_v39  ;;  %v127_v12 = vadd.f32 %v126_v7, %v2336_v5 }
  0xaf   :  { %2691 = vst [vmem:[#allocation12_spill] sm:$0xff] %v2376_v62 }
  0xb0   :  { %2692 = vst [vmem:[#allocation13_spill] sm:$0xff] %v2378_v3 }
  0xb1   :  { %2693 = vst [vmem:[#allocation14_spill] sm:$0xff] %v2381_v15 }
  0xb4   :  { %v194_v11 = vpop.f32.mrf.mxu2  ;;  %v223_v32 = vpop.f32.mrf.mxu3 }
  0xb5   :  { %v2387_v40 = vadd.f32 %v194_v11, %v2350_v20  ;;  %v2389_v41 = vadd.f32 %v223_v32, %v56_v21  ;;  %v138_v49 = vpop.f32.mrf.mxu0  ;;  %v162_v50 = vpop.f32.mrf.mxu1 }
  0xb6   :  { %v2392_v59 = vadd.f32 %v138_v49, %v2336_v5  ;;  %v2395_v61 = vadd.f32 %v162_v50, %v2362_v39 }
  0xb7   :  { %2694 = vst [vmem:[#allocation15_spill] sm:$0xff] %v2387_v40 }
  0xb8   :  { %2695 = vst [vmem:[#allocation16_spill] sm:$0xff] %v2389_v41 }
  0xb9   :  { %2696 = vst [vmem:[#allocation17_spill] sm:$0xff] %v2392_v59 }
  0xbc   :  { %v196_v17 = vpop.f32.mrf.mxu2  ;;  %v225_v8 = vpop.f32.mrf.mxu3 }
  0xbd   :  { %v2399_v9 = vadd.f32 %v196_v17, %v2350_v20  ;;  %v2401_v15 = vadd.f32 %v225_v8, %v56_v21  ;;  %v165_v11 = vpop.f32.mrf.mxu1  ;;  %v342_v32 = vpop.f32.mrf.mxu0 }
  0xbe   :  { %v2404_v41 = vadd.f32 %v165_v11, %v2362_v39  ;;  %v346_v40 = vadd.f32 %v342_v32, %v127_v12 }
  0xbf   :  { %2697 = vst [vmem:[#allocation18_spill] sm:$0xff] %v2399_v9 }
  0xc0   :  { %2698 = vst [vmem:[#allocation19_spill] sm:$0xff] %v2401_v15  ;;  %v1687_v49 = vmul.f32 -1.442695, %v346_v40 }
  0xc1   :  { %2699 = vst [vmem:[#allocation20_spill] sm:$0xff] %v2404_v41 }
  0xc2   :  { %1890 = vpow2.f32 %v1687_v49 }
  0xc4   :  { %v199_v59 = vpop.f32.mrf.mxu2  ;;  %v228_v50 = vpop.f32.mrf.mxu3 }
  0xc5   :  { %v2407_v3 = vadd.f32 %v199_v59, %v2350_v20  ;;  %v2409_v7 = vadd.f32 %v228_v50, %v56_v21  ;;  %v167_v5 = vpop.f32.mrf.mxu1  ;;  %v344_v17 = vpop.f32.mrf.mxu0 }
  0xc6   :  { %v2412_v8 = vadd.f32 %v167_v5, %v2362_v39  ;;  %v214_v17 = vadd.f32 %v2343_v13, %v56_v21  ;;  %v185_v5 = vadd.f32 %v2341_v10, %v2350_v20 }
  0xc7   :  { %2700 = vst [vmem:[#allocation21_spill] sm:$0xff] %v2407_v3 }
  0xc8   :  { %2701 = vst [vmem:[#allocation22_spill] sm:$0xff] %v2409_v7  ;;  %v1891_v15 = vpop.eup %1890 }
  0xc9   :  { %2702 = vst [vmem:[#allocation23_spill] sm:$0xff] %v2412_v8  ;;  %v350_v9 = vadd.f32 1.0, %v1891_v15 }
  0xcb   :  { %1892 = vrcp.f32 %v350_v9  ;;  %v360_v8 = vand.u32 2147483647, %v350_v9  ;;  %v362_v62 = vand.u32 2147483648, %v350_v9  ;;  %vm356_vm3 = vweird.f32 %v350_v9 }
  0xcc   :  { %v201_v11 = vpop.f32.mrf.mxu2  ;;  %v230_v41 = vpop.f32.mrf.mxu3 }
  0xcd   :  { %v2415_v40 = vadd.f32 %v201_v11, %v2350_v20  ;;  %v2417_v12 = vadd.f32 %v230_v41, %v56_v21  ;;  %v170_v32 = vpop.f32.mrf.mxu1  ;;  %v363_v13 = vor.u32 1.1754944e-38, %v362_v62  ;;  %vm361_vm5 = vcmp.eq.f32.partialorder %v360_v8, 8.507059e+37 }
  0xce   :  { %v2420_v59 = vadd.f32 %v170_v32, %v2362_v39 }
  0xcf   :  { %2703 = vst [vmem:[#allocation24_spill] sm:$0xff] %v2415_v40 }
  0xd0   :  { %2704 = vst [vmem:[#allocation25_spill] sm:$0xff] %v2417_v12 }
  0xd1   :  { %2705 = vst [vmem:[#allocation26_spill] sm:$0xff] %v2420_v59  ;;  %v1893_v49 = vpop.eup %1892 }
  0xd2   :  { %v352_v50 = vmul.f32 %v1893_v49, %v350_v9  ;;  %vm357_vm2 = vweird.f32 %v1893_v49 }
  0xd3   :  { %vm358_vm4 = vmor %vm356_vm3, %vm357_vm2 }
  0xd4   :  { %v353_v15 = vsub.f32 1.0, %v352_v50  ;;  %v536_v7 = vpop.f32.mrf.mxu2  ;;  %v633_v3 = vpop.f32.mrf.mxu3  ;;  %v156_v50 = vadd.f32 %v2357_v33, %v2362_v39 }
  0xd5   :  { %v637_v11 = vadd.f32 %v633_v3, %v214_v17  ;;  %v172_v40 = vpop.f32.mrf.mxu1  ;;  %v540_v41 = vadd.f32 %v536_v7, %v185_v5 }
  0xd6   :  { %v354_v12 = vmul.f32 %v1893_v49, %v353_v15  ;;  %v2426_v32 = vadd.f32 %v172_v40, %v2362_v39 }
  0xd7   :  { %1894 = vtanh.f32 %v637_v11  ;;  %v1753_v21 = vmul.f32 -1.442695, %v540_v41 }
  0xd8   :  { %2706 = vst [vmem:[#allocation27_spill] sm:$0xff] %v2426_v32  ;;  %v355_v59 = vadd.f32 %v1893_v49, %v354_v12 }
  0xd9   :  { %1896 = vpow2.f32 %v1753_v21 }
  0xda   :  { %v359_v10 = vsel %vm358_vm4, %v1893_v49, %v355_v59 }
  0xdb   :  { %v364_v20 = vsel %vm361_vm5, %v363_v13, %v359_v10 }
  0xdc   :  { %v538_v3 = vpop.f32.mrf.mxu2  ;;  %v635_v17 = vpop.f32.mrf.mxu3 }
  0xdd   :  { %v1895_v7 = vpop.eup %1894  ;;  %v439_v5 = vpop.f32.mrf.mxu1 }
  0xde   :  { %v640_v15 = vmul.f32 %v1895_v7, %v364_v20  ;;  %v443_v40 = vadd.f32 %v439_v5, %v156_v50 }
  0xdf   :  { %v1897_v12 = vpop.eup %1896 }
  0xe0   :  { %v1720_v32 = vmul.f32 -1.442695, %v443_v40  ;;  %v544_v11 = vadd.f32 1.0, %v1897_v12 }
  0xe2   :  { %1898 = vpow2.f32 %v1720_v32  ;;  %vm550_vm11 = vweird.f32 %v544_v11 }
  0xe3   :  { %1900 = vrcp.f32 %v544_v11 }
  0xe5   :  { %v441_v9 = vpop.f32.mrf.mxu1 }
  0xe6   :  { %v556_v9 = vand.u32 2147483648, %v544_v11 }
  0xe8   :  { %v1899_v62 = vpop.eup %1898 }
  0xe9   :  { %v447_v41 = vadd.f32 1.0, %v1899_v62  ;;  %v1901_v8 = vpop.eup %1900  ;;  %v554_v62 = vand.u32 2147483647, %v544_v11 }
  0xea   :  { %v546_v33 = vmul.f32 %v1901_v8, %v544_v11  ;;  %vm551_vm10 = vweird.f32 %v1901_v8 }
  0xeb   :  { %1902 = vrcp.f32 %v447_v41  ;;  %v459_v13 = vand.u32 2147483648, %v447_v41  ;;  %v457_v21 = vand.u32 2147483647, %v447_v41  ;;  %vm453_vm7 = vweird.f32 %v447_v41  ;;  %vm552_vm12 = vmor %vm550_vm11, %vm551_vm10 }
  0xec   :  { %v547_v20 = vsub.f32 1.0, %v546_v33  ;;  %v557_v33 = vor.u32 1.1754944e-38, %v556_v9  ;;  %vm555_vm13 = vcmp.eq.f32.partialorder %v554_v62, 8.507059e+37 }
  0xed   :  { %v460_v32 = vor.u32 1.1754944e-38, %v459_v13  ;;  %vm458_vm9 = vcmp.eq.f32.partialorder %v457_v21, 8.507059e+37 }
  0xee   :  { %v548_v7 = vmul.f32 %v1901_v8, %v547_v20 }
  0xf0   :  { %v549_v12 = vadd.f32 %v1901_v8, %v548_v7 }
  0xf1   :  { %v1903_v59 = vpop.eup %1902 }
  0xf2   :  { %v449_v49 = vmul.f32 %v1903_v59, %v447_v41  ;;  %vm454_vm6 = vweird.f32 %v1903_v59 }
  0xf3   :  { %vm455_vm8 = vmor %vm453_vm7, %vm454_vm6 }
  0xf4   :  { %v450_v39 = vsub.f32 1.0, %v449_v49  ;;  %v553_v49 = vsel %vm552_vm12, %v1901_v8, %v549_v12 }
  0xf6   :  { %v451_v10 = vmul.f32 %v1903_v59, %v450_v39  ;;  %v558_v39 = vsel %vm555_vm13, %v557_v33, %v553_v49 }
  0xf8   :  { %v452_v50 = vadd.f32 %v1903_v59, %v451_v10 }
  0xfa   :  { %v456_v3 = vsel %vm455_vm8, %v1903_v59, %v452_v50 }
  0xfb   :  { %v461_v17 = vsel %vm458_vm9, %v460_v32, %v456_v3 }
  0xfc   :  { %v639_v5 = vmul.f32 0.0, %v461_v17 }
  0xfe   :  { %v2430_v40 = vadd.f32 %v640_v15, %v639_v5 }
 0x100   :  { %1904 = vtanh.f32 %v2430_v40 }
 0x106   :  { %v1905_v41 = vpop.eup %1904 }
 0x107   :  { %v643_v59 = vmul.f32 %v1905_v41, %v558_v39 }
 0x109   :  { %v644_v13 = vpack.c.bf16 %v643_v59, %v643_v59 }
 0x10b   :  { %657 = vmatmul.bf16.vlgmr.msra.gmra.mxu0 %v644_v13  ;;  %690 = vmatmul.bf16.vlgmr.msrb.gmra.mxu1 %v644_v13 }
 0x10c   :  { %723 = vmatmul.bf16.vlgmr.msra.gmra.mxu2 %v644_v13  ;;  %756 = vmatmul.bf16.vlgmr.msra.gmra.mxu3 %v644_v13 }
 0x10d   :  { %897 = vmatpush.bf16.msra.mxu0 %v2133_v16  ;;  %930 = vmatpush.bf16.msrb.mxu1 %v2139_v25 }
 0x10e   :  { %963 = vmatpush.bf16.msra.mxu2 %v2141_v26  ;;  %996 = vmatpush.bf16.msra.mxu3 %v2150_v36 }
 0x111   :  { %898 = vmatpush.bf16.msra.mxu0 %v2144_v30  ;;  %931 = vmatpush.bf16.msrb.mxu1 %v2158_v37 }
 0x112   :  { %964 = vmatpush.bf16.msra.mxu2 %v2160_v38  ;;  %997 = vmatpush.bf16.msra.mxu3 %v2166_v48 }
 0x115   :  { %899 = vmatpush.bf16.msra.mxu0 %v2163_v42  ;;  %932 = vmatpush.bf16.msrb.mxu1 %v2170_v51 }
 0x116   :  { %965 = vmatpush.bf16.msra.mxu2 %v2172_v53  ;;  %998 = vmatpush.bf16.msra.mxu3 %v2178_v57 }
 0x119   :  { %900 = vmatpush.bf16.msra.mxu0 %v2175_v55  ;;  %933 = vmatpush.bf16.msrb.mxu1 %v2182_v63 }
 0x11a   :  { %966 = vmatpush.bf16.msra.mxu2 %v2184_v0  ;;  %999 = vmatpush.bf16.msra.mxu3 %v2190_v2 }
 0x11d   :  { %901 = vmatpush.bf16.msra.mxu0 %v2187_v1  ;;  %934 = vmatpush.bf16.msrb.mxu1 %v2215_v23 }
 0x11e   :  { %967 = vmatpush.bf16.msra.mxu2 %v2207_v14  ;;  %1000 = vmatpush.bf16.msra.mxu3 %v2213_v19 }
 0x121   :  { %902 = vmatpush.bf16.msra.mxu0 %v2200_v6  ;;  %935 = vmatpush.bf16.msrb.mxu1 %v2227_v35 }
 0x122   :  { %968 = vmatpush.bf16.msra.mxu2 %v2222_v29  ;;  %1001 = vmatpush.bf16.msra.mxu3 %v2224_v31 }
 0x125   :  { %903 = vmatpush.bf16.msra.mxu0 %v2219_v28  ;;  %936 = vmatpush.bf16.msrb.mxu1 %v2258_v60 }
 0x126   :  { %969 = vmatpush.bf16.msra.mxu2 %v2230_v43  ;;  %1002 = vmatpush.bf16.msra.mxu3 %v2236_v45 }
 0x129   :  { %904 = vmatpush.bf16.msra.mxu0 %v2233_v44  ;;  %937 = vmatpush.bf16.msrb.mxu1 %v2263_v4 }
 0x12a   :  { %970 = vmatpush.bf16.msra.mxu2 %v2240_v52  ;;  %1003 = vmatpush.bf16.msra.mxu3 %v2244_v54 }
 0x188   :  { %v658_v15 = vpop.f32.mrf.mxu0  ;;  %v691_v11 = vpop.f32.mrf.mxu1 }
 0x189   :  { %v662_v8 = vadd.f32 %v658_v15, %v2348_v18  ;;  %v695_v10 = vadd.f32 %v691_v11, %v2373_v58 }
 0x18b   :  { %v1786_v21 = vmul.f32 -1.442695, %v662_v8  ;;  %v1787_v20 = vmul.f32 -1.442695, %v695_v10 }
 0x18d   :  { %1906 = vpow2.f32 %v1786_v21 }
 0x18e   :  { %1908 = vpow2.f32 %v1787_v20 }
 0x18f   :  { %v724_v50 = vpop.f32.mrf.mxu2  ;;  %v757_v32 = vpop.f32.mrf.mxu3 }
 0x190   :  { %v728_v3 = vadd.f32 %v724_v50, %v2353_v24  ;;  %v660_v17 = vpop.f32.mrf.mxu0  ;;  %v693_v7 = vpop.f32.mrf.mxu1  ;;  %v761_v59 = vadd.f32 %v757_v32, %v2355_v27 }
 0x192   :  { %v1788_v5 = vmul.f32 -1.442695, %v728_v3 }
 0x193   :  { %v1907_v12 = vpop.eup %1906 }
 0x194   :  { %v1909_v9 = vpop.eup %1908  ;;  %v666_v62 = vadd.f32 1.0, %v1907_v12  ;;  %1910 = vpow2.f32 %v1788_v5 }
 0x195   :  { %v699_v49 = vadd.f32 1.0, %v1909_v9 }
 0x196   :  { %1912 = vrcp.f32 %v666_v62  ;;  %v678_v10 = vand.u32 2147483648, %v666_v62  ;;  %v676_v50 = vand.u32 2147483647, %v666_v62  ;;  %vm672_vm0 = vweird.f32 %v666_v62 }
 0x197   :  { %1914 = vrcp.f32 %v699_v49  ;;  %v726_v18 = vpop.f32.mrf.mxu2  ;;  %v759_v58 = vpop.f32.mrf.mxu3  ;;  %v711_v21 = vand.u32 2147483648, %v699_v49  ;;  %v709_v17 = vand.u32 2147483647, %v699_v49  ;;  %vm705_vm2 = vweird.f32 %v699_v49 }
 0x198   :  { %v679_v32 = vor.u32 1.1754944e-38, %v678_v10  ;;  %vm677_vm5 = vcmp.eq.f32.partialorder %v676_v50, 8.507059e+37 }
 0x199   :  { %v712_v9 = vor.u32 1.1754944e-38, %v711_v21  ;;  %vm710_vm6 = vcmp.eq.f32.partialorder %v709_v17, 8.507059e+37 }
 0x19a   :  { %v1911_v33 = vpop.eup %1910 }
 0x19b   :  { %v732_v41 = vadd.f32 1.0, %v1911_v33 }
 0x19c   :  { %v1913_v39 = vpop.eup %1912 }
 0x19d   :  { %v1915_v13 = vpop.eup %1914  ;;  %v668_v15 = vmul.f32 %v1913_v39, %v666_v62  ;;  %1916 = vrcp.f32 %v732_v41  ;;  %vm673_vm14 = vweird.f32 %v1913_v39  ;;  %v744_v10 = vand.u32 2147483648, %v732_v41 }
 0x19e   :  { %v701_v24 = vmul.f32 %v1915_v13, %v699_v49  ;;  %1918 = vtanh.f32 %v761_v59  ;;  %vm706_vm15 = vweird.f32 %v1915_v13  ;;  %vm674_vm3 = vmor %vm672_vm0, %vm673_vm14  ;;  %vm738_vm8 = vweird.f32 %v732_v41 }
 0x19f   :  { %v669_v11 = vsub.f32 1.0, %v668_v15  ;;  %vm707_vm4 = vmor %vm705_vm2, %vm706_vm15  ;;  %v745_v50 = vor.u32 1.1754944e-38, %v744_v10 }
 0x1a0   :  { %v702_v8 = vsub.f32 1.0, %v701_v24 }
 0x1a1   :  { %v670_v20 = vmul.f32 %v1913_v39, %v669_v11 }
 0x1a2   :  { %v703_v3 = vmul.f32 %v1915_v13, %v702_v8 }
 0x1a3   :  { %v1917_v7 = vpop.eup %1916  ;;  %v671_v5 = vadd.f32 %v1913_v39, %v670_v20 }
 0x1a4   :  { %v734_v27 = vmul.f32 %v1917_v7, %v732_v41  ;;  %v704_v12 = vadd.f32 %v1915_v13, %v703_v3  ;;  %v1919_v58 = vpop.eup %1918  ;;  %vm739_vm7 = vweird.f32 %v1917_v7 }
 0x1a5   :  { %v675_v18 = vsel %vm674_vm3, %v1913_v39, %v671_v5  ;;  %v742_v39 = vand.u32 2147483647, %v732_v41  ;;  %vm740_vm9 = vmor %vm738_vm8, %vm739_vm7 }
 0x1a6   :  { %v735_v33 = vsub.f32 1.0, %v734_v27  ;;  %v680_v59 = vsel %vm677_vm5, %v679_v32, %v675_v18  ;;  %v708_v15 = vsel %vm707_vm4, %v1915_v13, %v704_v12 }
 0x1a7   :  { %v713_v24 = vsel %vm710_vm6, %v712_v9, %v708_v15  ;;  %v764_v11 = vmul.f32 %v1919_v58, %v680_v59  ;;  %vm743_vm10 = vcmp.eq.f32.partialorder %v742_v39, 8.507059e+37 }
 0x1a8   :  { %v763_v8 = vmul.f32 %v713_v24, %v2430_v40  ;;  %v736_v20 = vmul.f32 %v1917_v7, %v735_v33 }
 0x1aa   :  { %v2470_v62 = vadd.f32 %v764_v11, %v763_v8  ;;  %v737_v49 = vadd.f32 %v1917_v7, %v736_v20 }
 0x1ac   :  { %1920 = vtanh.f32 %v2470_v62  ;;  %v741_v21 = vsel %vm740_vm9, %v1917_v7, %v737_v49 }
 0x1ad   :  { %v746_v3 = vsel %vm743_vm10, %v745_v50, %v741_v21 }
 0x1b2   :  { %v1921_v13 = vpop.eup %1920 }
 0x1b3   :  { %v767_v17 = vmul.f32 %v1921_v13, %v746_v3 }
 0x1b5   :  { %v768_v5 = vpack.c.bf16 %v767_v17, %v767_v17 }
 0x1b7   :  { %781 = vmatmul.bf16.vlgmr.msrb.gmra.mxu0 %v768_v5  ;;  %814 = vmatmul.bf16.vlgmr.msra.gmra.mxu1 %v768_v5 }
 0x1b8   :  { %847 = vmatmul.bf16.vlgmr.msrb.gmra.mxu2 %v768_v5  ;;  %880 = vmatmul.bf16.vlgmr.msrb.gmra.mxu3 %v768_v5 }
 0x1b9   :  { %1021 = vmatpush.bf16.msrb.mxu0 %v2133_v16  ;;  %1054 = vmatpush.bf16.msra.mxu1 %v2139_v25 }
 0x1ba   :  { %1087 = vmatpush.bf16.msrb.mxu2 %v2141_v26  ;;  %1120 = vmatpush.bf16.msrb.mxu3 %v2150_v36 }
 0x1bd   :  { %1022 = vmatpush.bf16.msrb.mxu0 %v2144_v30  ;;  %1055 = vmatpush.bf16.msra.mxu1 %v2158_v37 }
 0x1be   :  { %1088 = vmatpush.bf16.msrb.mxu2 %v2160_v38  ;;  %1121 = vmatpush.bf16.msrb.mxu3 %v2166_v48 }
 0x1c1   :  { %1023 = vmatpush.bf16.msrb.mxu0 %v2163_v42  ;;  %1056 = vmatpush.bf16.msra.mxu1 %v2170_v51 }
 0x1c2   :  { %1089 = vmatpush.bf16.msrb.mxu2 %v2172_v53  ;;  %1122 = vmatpush.bf16.msrb.mxu3 %v2178_v57 }
 0x1c5   :  { %1024 = vmatpush.bf16.msrb.mxu0 %v2175_v55  ;;  %1057 = vmatpush.bf16.msra.mxu1 %v2182_v63 }
 0x1c6   :  { %1090 = vmatpush.bf16.msrb.mxu2 %v2184_v0  ;;  %1123 = vmatpush.bf16.msrb.mxu3 %v2190_v2 }
 0x1c9   :  { %1025 = vmatpush.bf16.msrb.mxu0 %v2187_v1  ;;  %1058 = vmatpush.bf16.msra.mxu1 %v2215_v23 }
 0x1ca   :  { %1091 = vmatpush.bf16.msrb.mxu2 %v2207_v14  ;;  %1124 = vmatpush.bf16.msrb.mxu3 %v2213_v19 }
 0x1cd   :  { %1026 = vmatpush.bf16.msrb.mxu0 %v2200_v6  ;;  %1059 = vmatpush.bf16.msra.mxu1 %v2227_v35 }
 0x1ce   :  { %1092 = vmatpush.bf16.msrb.mxu2 %v2222_v29  ;;  %1125 = vmatpush.bf16.msrb.mxu3 %v2224_v31 }
 0x1d1   :  { %1027 = vmatpush.bf16.msrb.mxu0 %v2219_v28  ;;  %1060 = vmatpush.bf16.msra.mxu1 %v2258_v60 }
 0x1d2   :  { %1093 = vmatpush.bf16.msrb.mxu2 %v2230_v43  ;;  %1126 = vmatpush.bf16.msrb.mxu3 %v2236_v45 }
 0x1d5   :  { %1028 = vmatpush.bf16.msrb.mxu0 %v2233_v44  ;;  %1061 = vmatpush.bf16.msra.mxu1 %v2263_v4 }
 0x1d6   :  { %1094 = vmatpush.bf16.msrb.mxu2 %v2240_v52  ;;  %1127 = vmatpush.bf16.msrb.mxu3 %v2244_v54 }
 0x234   :  { %v782_v40 = vpop.f32.mrf.mxu0  ;;  %v815_v41 = vpop.f32.mrf.mxu1 }
 0x235   :  { %v786_v7 = vadd.f32 %v782_v40, %v2360_v34  ;;  %v819_v27 = vadd.f32 %v815_v41, %v2384_v22 }
 0x237   :  { %v1789_v32 = vmul.f32 -1.442695, %v786_v7  ;;  %v1790_v12 = vmul.f32 -1.442695, %v819_v27 }
 0x239   :  { %1922 = vpow2.f32 %v1789_v32 }
 0x23a   :  { %1924 = vpow2.f32 %v1790_v12 }
 0x23b   :  { %v848_v9 = vpop.f32.mrf.mxu2  ;;  %v881_v18 = vpop.f32.mrf.mxu3 }
 0x23c   :  { %v852_v58 = vadd.f32 %v848_v9, %v2365_v46  ;;  %v784_v33 = vpop.f32.mrf.mxu0  ;;  %v817_v59 = vpop.f32.mrf.mxu1  ;;  %v885_v21 = vadd.f32 %v881_v18, %v2367_v47 }
 0x23e   :  { %v1791_v15 = vmul.f32 -1.442695, %v852_v58 }
 0x23f   :  { %v1923_v24 = vpop.eup %1922 }
 0x240   :  { %v1925_v11 = vpop.eup %1924  ;;  %v790_v8 = vadd.f32 1.0, %v1923_v24  ;;  %1926 = vpow2.f32 %v1791_v15 }
 0x241   :  { %v823_v20 = vadd.f32 1.0, %v1925_v11 }
 0x242   :  { %1928 = vrcp.f32 %v790_v8  ;;  %v802_v5 = vand.u32 2147483648, %v790_v8  ;;  %v800_v7 = vand.u32 2147483647, %v790_v8  ;;  %vm796_vm13 = vweird.f32 %v790_v8 }
 0x243   :  { %1930 = vrcp.f32 %v823_v20  ;;  %v850_v34 = vpop.f32.mrf.mxu2  ;;  %v883_v22 = vpop.f32.mrf.mxu3  ;;  %v835_v40 = vand.u32 2147483648, %v823_v20  ;;  %v833_v32 = vand.u32 2147483647, %v823_v20  ;;  %vm829_vm14 = vweird.f32 %v823_v20 }
 0x244   :  { %v803_v18 = vor.u32 1.1754944e-38, %v802_v5  ;;  %vm801_vm2 = vcmp.eq.f32.partialorder %v800_v7, 8.507059e+37 }
 0x245   :  { %v836_v33 = vor.u32 1.1754944e-38, %v835_v40  ;;  %vm834_vm3 = vcmp.eq.f32.partialorder %v833_v32, 8.507059e+37 }
 0x246   :  { %v1927_v49 = vpop.eup %1926 }
 0x247   :  { %v856_v10 = vadd.f32 1.0, %v1927_v49 }
 0x248   :  { %v1929_v39 = vpop.eup %1928 }
 0x249   :  { %v1931_v50 = vpop.eup %1930  ;;  %v792_v13 = vmul.f32 %v1929_v39, %v790_v8  ;;  %1932 = vrcp.f32 %v856_v10  ;;  %vm797_vm11 = vweird.f32 %v1929_v39  ;;  %vm862_vm5 = vweird.f32 %v856_v10 }
 0x24a   :  { %v825_v46 = vmul.f32 %v1931_v50, %v823_v20  ;;  %1934 = vtanh.f32 %v885_v21  ;;  %vm830_vm12 = vweird.f32 %v1931_v50  ;;  %vm798_vm15 = vmor %vm796_vm13, %vm797_vm11 }
 0x24b   :  { %v793_v3 = vsub.f32 1.0, %v792_v13  ;;  %vm831_vm0 = vmor %vm829_vm14, %vm830_vm12 }
 0x24c   :  { %v826_v17 = vsub.f32 1.0, %v825_v46  ;;  %v868_v46 = vand.u32 2147483648, %v856_v10 }
 0x24d   :  { %v794_v41 = vmul.f32 %v1929_v39, %v793_v3 }
 0x24e   :  { %v827_v27 = vmul.f32 %v1931_v50, %v826_v17  ;;  %v869_v17 = vor.u32 1.1754944e-38, %v868_v46 }
 0x24f   :  { %v1933_v12 = vpop.eup %1932  ;;  %v795_v9 = vadd.f32 %v1929_v39, %v794_v41 }
 0x250   :  { %v858_v47 = vmul.f32 %v1933_v12, %v856_v10  ;;  %v828_v58 = vadd.f32 %v1931_v50, %v827_v27  ;;  %v1935_v15 = vpop.eup %1934  ;;  %vm863_vm4 = vweird.f32 %v1933_v12 }
 0x251   :  { %v799_v59 = vsel %vm798_vm15, %v1929_v39, %v795_v9  ;;  %v866_v39 = vand.u32 2147483647, %v856_v10  ;;  %vm864_vm6 = vmor %vm862_vm5, %vm863_vm4 }
 0x252   :  { %v859_v24 = vsub.f32 1.0, %v858_v47  ;;  %v804_v11 = vsel %vm801_vm2, %v803_v18, %v799_v59  ;;  %v832_v34 = vsel %vm831_vm0, %v1931_v50, %v828_v58  ;;  %v2707_v18 = vld [vmem:[#allocation12_spill] sm:$0xff] }
 0x253   :  { %v837_v22 = vsel %vm834_vm3, %v836_v33, %v832_v34  ;;  %v888_v49 = vmul.f32 %v1935_v15, %v804_v11  ;;  %vm867_vm7 = vcmp.eq.f32.partialorder %v866_v39, 8.507059e+37 }
 0x254   :  { %v887_v21 = vmul.f32 %v837_v22, %v2470_v62  ;;  %v860_v13 = vmul.f32 %v1933_v12, %v859_v24 }
 0x256   :  { %v2510_v8 = vadd.f32 %v888_v49, %v887_v21  ;;  %v861_v20 = vadd.f32 %v1933_v12, %v860_v13 }
 0x258   :  { %1936 = vtanh.f32 %v2510_v8  ;;  %v865_v3 = vsel %vm864_vm6, %v1933_v12, %v861_v20  ;;  %v2708_v20 = vld [vmem:[#allocation13_spill] sm:$0xff] }
 0x259   :  { %v870_v5 = vsel %vm867_vm7, %v869_v17, %v865_v3 }
 0x25e   :  { %v1937_v50 = vpop.eup %1936 }
 0x25f   :  { %v891_v40 = vmul.f32 %v1937_v50, %v870_v5 }
 0x261   :  { %v892_v41 = vpack.c.bf16 %v891_v40, %v891_v40 }
 0x263   :  { %905 = vmatmul.bf16.vlgmr.msra.gmra.mxu0 %v892_v41  ;;  %938 = vmatmul.bf16.vlgmr.msrb.gmra.mxu1 %v892_v41 }
 0x264   :  { %971 = vmatmul.bf16.vlgmr.msra.gmra.mxu2 %v892_v41  ;;  %1004 = vmatmul.bf16.vlgmr.msra.gmra.mxu3 %v892_v41 }
 0x265   :  { %1145 = vmatpush.bf16.msra.mxu0 %v2133_v16  ;;  %1178 = vmatpush.bf16.msrb.mxu1 %v2139_v25 }
 0x266   :  { %1211 = vmatpush.bf16.msra.mxu2 %v2141_v26  ;;  %1244 = vmatpush.bf16.msra.mxu3 %v2150_v36 }
 0x269   :  { %1146 = vmatpush.bf16.msra.mxu0 %v2144_v30  ;;  %1179 = vmatpush.bf16.msrb.mxu1 %v2158_v37 }
 0x26a   :  { %1212 = vmatpush.bf16.msra.mxu2 %v2160_v38  ;;  %1245 = vmatpush.bf16.msra.mxu3 %v2166_v48 }
 0x26d   :  { %1147 = vmatpush.bf16.msra.mxu0 %v2163_v42  ;;  %1180 = vmatpush.bf16.msrb.mxu1 %v2170_v51 }
 0x26e   :  { %1213 = vmatpush.bf16.msra.mxu2 %v2172_v53  ;;  %1246 = vmatpush.bf16.msra.mxu3 %v2178_v57 }
 0x271   :  { %1148 = vmatpush.bf16.msra.mxu0 %v2175_v55  ;;  %1181 = vmatpush.bf16.msrb.mxu1 %v2182_v63 }
 0x272   :  { %1214 = vmatpush.bf16.msra.mxu2 %v2184_v0  ;;  %1247 = vmatpush.bf16.msra.mxu3 %v2190_v2 }
 0x275   :  { %1149 = vmatpush.bf16.msra.mxu0 %v2187_v1  ;;  %1182 = vmatpush.bf16.msrb.mxu1 %v2215_v23 }
 0x276   :  { %1215 = vmatpush.bf16.msra.mxu2 %v2207_v14  ;;  %1248 = vmatpush.bf16.msra.mxu3 %v2213_v19 }
 0x279   :  { %1150 = vmatpush.bf16.msra.mxu0 %v2200_v6  ;;  %1183 = vmatpush.bf16.msrb.mxu1 %v2227_v35 }
 0x27a   :  { %1216 = vmatpush.bf16.msra.mxu2 %v2222_v29  ;;  %1249 = vmatpush.bf16.msra.mxu3 %v2224_v31 }
 0x27d   :  { %1151 = vmatpush.bf16.msra.mxu0 %v2219_v28  ;;  %1184 = vmatpush.bf16.msrb.mxu1 %v2258_v60 }
 0x27e   :  { %1217 = vmatpush.bf16.msra.mxu2 %v2230_v43  ;;  %1250 = vmatpush.bf16.msra.mxu3 %v2236_v45 }
 0x281   :  { %1152 = vmatpush.bf16.msra.mxu0 %v2233_v44  ;;  %1185 = vmatpush.bf16.msrb.mxu1 %v2263_v4 }
 0x282   :  { %1218 = vmatpush.bf16.msra.mxu2 %v2240_v52  ;;  %1251 = vmatpush.bf16.msra.mxu3 %v2244_v54 }
 0x2e0   :  { %v906_v62 = vpop.f32.mrf.mxu0  ;;  %v939_v10 = vpop.f32.mrf.mxu1 }
 0x2e1   :  { %v910_v7 = vadd.f32 %v906_v62, %v2370_v56  ;;  %v943_v27 = vadd.f32 %v939_v10, %v2395_v61 }
 0x2e3   :  { %v1792_v32 = vmul.f32 -1.442695, %v910_v7  ;;  %v1793_v12 = vmul.f32 -1.442695, %v943_v27 }
 0x2e5   :  { %1938 = vpow2.f32 %v1792_v32 }
 0x2e6   :  { %1940 = vpow2.f32 %v1793_v12 }
 0x2e7   :  { %v972_v9 = vpop.f32.mrf.mxu2  ;;  %v1005_v47 = vpop.f32.mrf.mxu3 }
 0x2e8   :  { %v976_v58 = vadd.f32 %v972_v9, %v2707_v18  ;;  %v908_v33 = vpop.f32.mrf.mxu0  ;;  %v941_v59 = vpop.f32.mrf.mxu1  ;;  %v1009_v46 = vadd.f32 %v1005_v47, %v2708_v20 }
 0x2ea   :  { %v1794_v15 = vmul.f32 -1.442695, %v976_v58 }
 0x2eb   :  { %v1939_v24 = vpop.eup %1938 }
 0x2ec   :  { %v1941_v11 = vpop.eup %1940  ;;  %v914_v34 = vadd.f32 1.0, %v1939_v24  ;;  %1942 = vpow2.f32 %v1794_v15 }
 0x2ed   :  { %v947_v22 = vadd.f32 1.0, %v1941_v11 }
 0x2ee   :  { %1944 = vrcp.f32 %v914_v34  ;;  %v926_v40 = vand.u32 2147483648, %v914_v34  ;;  %v924_v10 = vand.u32 2147483647, %v914_v34  ;;  %vm920_vm10 = vweird.f32 %v914_v34 }
 0x2ef   :  { %1946 = vrcp.f32 %v947_v22  ;;  %v974_v56 = vpop.f32.mrf.mxu2  ;;  %v1007_v61 = vpop.f32.mrf.mxu3  ;;  %v959_v41 = vand.u32 2147483648, %v947_v22  ;;  %v957_v27 = vand.u32 2147483647, %v947_v22  ;;  %vm953_vm11 = vweird.f32 %v947_v22 }
 0x2f0   :  { %v927_v47 = vor.u32 1.1754944e-38, %v926_v40  ;;  %vm925_vm14 = vcmp.eq.f32.partialorder %v924_v10, 8.507059e+37  ;;  %v2710_v10 = vld [vmem:[#allocation20_spill] sm:$0xff] }
 0x2f1   :  { %v960_v58 = vor.u32 1.1754944e-38, %v959_v41  ;;  %vm958_vm15 = vcmp.eq.f32.partialorder %v957_v27, 8.507059e+37  ;;  %v2709_v41 = vld [vmem:[#allocation14_spill] sm:$0xff] }
 0x2f2   :  { %v1943_v49 = vpop.eup %1942 }
 0x2f3   :  { %v980_v21 = vadd.f32 1.0, %v1943_v49 }
 0x2f4   :  { %v1945_v13 = vpop.eup %1944 }
 0x2f5   :  { %v1947_v39 = vpop.eup %1946  ;;  %v916_v3 = vmul.f32 %v1945_v13, %v914_v34  ;;  %1948 = vrcp.f32 %v980_v21  ;;  %vm921_vm8 = vweird.f32 %v1945_v13  ;;  %vm986_vm2 = vweird.f32 %v980_v21 }
 0x2f6   :  { %v949_v17 = vmul.f32 %v1947_v39, %v947_v22  ;;  %1950 = vtanh.f32 %v1009_v46  ;;  %vm954_vm9 = vweird.f32 %v1947_v39  ;;  %vm922_vm12 = vmor %vm920_vm10, %vm921_vm8  ;;  %v992_v46 = vand.u32 2147483648, %v980_v21 }
 0x2f7   :  { %v917_v50 = vsub.f32 1.0, %v916_v3  ;;  %vm955_vm13 = vmor %vm953_vm11, %vm954_vm9 }
 0x2f8   :  { %v950_v5 = vsub.f32 1.0, %v949_v17  ;;  %v993_v17 = vor.u32 1.1754944e-38, %v992_v46 }
 0x2f9   :  { %v918_v62 = vmul.f32 %v1945_v13, %v917_v50 }
 0x2fa   :  { %v951_v7 = vmul.f32 %v1947_v39, %v950_v5 }
 0x2fb   :  { %v1949_v32 = vpop.eup %1948  ;;  %v919_v12 = vadd.f32 %v1945_v13, %v918_v62 }
 0x2fc   :  { %v982_v9 = vmul.f32 %v1949_v32, %v980_v21  ;;  %v952_v18 = vadd.f32 %v1947_v39, %v951_v7  ;;  %v1951_v59 = vpop.eup %1950  ;;  %vm987_vm0 = vweird.f32 %v1949_v32 }
 0x2fd   :  { %v923_v33 = vsel %vm922_vm12, %v1945_v13, %v919_v12  ;;  %v990_v13 = vand.u32 2147483647, %v980_v21  ;;  %vm988_vm3 = vmor %vm986_vm2, %vm987_vm0 }
 0x2fe   :  { %v983_v15 = vsub.f32 1.0, %v982_v9  ;;  %v928_v24 = vsel %vm925_vm14, %v927_v47, %v923_v33  ;;  %v956_v11 = vsel %vm955_vm13, %v1947_v39, %v952_v18  ;;  %v2711_v47 = vld [vmem:[#allocation15_spill] sm:$0xff] }
 0x2ff   :  { %v961_v56 = vsel %vm958_vm15, %v960_v58, %v956_v11  ;;  %v1012_v61 = vmul.f32 %v1951_v59, %v928_v24  ;;  %vm991_vm4 = vcmp.eq.f32.partialorder %v990_v13, 8.507059e+37  ;;  %v2712_v13 = vld [vmem:[#allocation16_spill] sm:$0xff] }
 0x300   :  { %v1011_v49 = vmul.f32 %v961_v56, %v2510_v8  ;;  %v984_v20 = vmul.f32 %v1949_v32, %v983_v15 }
 0x302   :  { %v2550_v34 = vadd.f32 %v1012_v61, %v1011_v49  ;;  %v985_v22 = vadd.f32 %v1949_v32, %v984_v20 }
 0x304   :  { %1952 = vtanh.f32 %v2550_v34  ;;  %v989_v3 = vsel %vm988_vm3, %v1949_v32, %v985_v22 }
 0x305   :  { %v994_v50 = vsel %vm991_vm4, %v993_v17, %v989_v3 }
 0x30a   :  { %v1953_v39 = vpop.eup %1952 }
 0x30b   :  { %v1015_v5 = vmul.f32 %v1953_v39, %v994_v50 }
 0x30d   :  { %v1016_v40 = vpack.c.bf16 %v1015_v5, %v1015_v5 }
 0x30f   :  { %1029 = vmatmul.bf16.vlgmr.msrb.gmra.mxu0 %v1016_v40  ;;  %1062 = vmatmul.bf16.vlgmr.msra.gmra.mxu1 %v1016_v40 }
 0x310   :  { %1095 = vmatmul.bf16.vlgmr.msrb.gmra.mxu2 %v1016_v40  ;;  %1128 = vmatmul.bf16.vlgmr.msrb.gmra.mxu3 %v1016_v40 }
 0x311   :  { %1269 = vmatpush.bf16.msrb.mxu0 %v2133_v16  ;;  %1302 = vmatpush.bf16.msra.mxu1 %v2139_v25 }
 0x312   :  { %1335 = vmatpush.bf16.msrb.mxu2 %v2141_v26  ;;  %1368 = vmatpush.bf16.msrb.mxu3 %v2150_v36 }
 0x315   :  { %1270 = vmatpush.bf16.msrb.mxu0 %v2144_v30  ;;  %1303 = vmatpush.bf16.msra.mxu1 %v2158_v37 }
 0x316   :  { %1336 = vmatpush.bf16.msrb.mxu2 %v2160_v38  ;;  %1369 = vmatpush.bf16.msrb.mxu3 %v2166_v48 }
 0x319   :  { %1271 = vmatpush.bf16.msrb.mxu0 %v2163_v42  ;;  %1304 = vmatpush.bf16.msra.mxu1 %v2170_v51 }
 0x31a   :  { %1337 = vmatpush.bf16.msrb.mxu2 %v2172_v53  ;;  %1370 = vmatpush.bf16.msrb.mxu3 %v2178_v57 }
 0x31d   :  { %1272 = vmatpush.bf16.msrb.mxu0 %v2175_v55  ;;  %1305 = vmatpush.bf16.msra.mxu1 %v2182_v63 }
 0x31e   :  { %1338 = vmatpush.bf16.msrb.mxu2 %v2184_v0  ;;  %1371 = vmatpush.bf16.msrb.mxu3 %v2190_v2 }
 0x321   :  { %1273 = vmatpush.bf16.msrb.mxu0 %v2187_v1  ;;  %1306 = vmatpush.bf16.msra.mxu1 %v2215_v23 }
 0x322   :  { %1339 = vmatpush.bf16.msrb.mxu2 %v2207_v14  ;;  %1372 = vmatpush.bf16.msrb.mxu3 %v2213_v19 }
 0x325   :  { %1274 = vmatpush.bf16.msrb.mxu0 %v2200_v6  ;;  %1307 = vmatpush.bf16.msra.mxu1 %v2227_v35 }
 0x326   :  { %1340 = vmatpush.bf16.msrb.mxu2 %v2222_v29  ;;  %1373 = vmatpush.bf16.msrb.mxu3 %v2224_v31 }
 0x329   :  { %1275 = vmatpush.bf16.msrb.mxu0 %v2219_v28  ;;  %1308 = vmatpush.bf16.msra.mxu1 %v2258_v60 }
 0x32a   :  { %1341 = vmatpush.bf16.msrb.mxu2 %v2230_v43  ;;  %1374 = vmatpush.bf16.msrb.mxu3 %v2236_v45 }
 0x32d   :  { %1276 = vmatpush.bf16.msrb.mxu0 %v2233_v44  ;;  %1309 = vmatpush.bf16.msra.mxu1 %v2263_v4 }
 0x32e   :  { %1342 = vmatpush.bf16.msrb.mxu2 %v2240_v52  ;;  %1375 = vmatpush.bf16.msrb.mxu3 %v2244_v54 }
 0x38c   :  { %v1030_v8 = vpop.f32.mrf.mxu0  ;;  %v1063_v21 = vpop.f32.mrf.mxu1 }
 0x38d   :  { %v1034_v62 = vadd.f32 %v1030_v8, %v2709_v41  ;;  %v1067_v7 = vadd.f32 %v1063_v21, %v2710_v10 }
 0x38f   :  { %v1795_v27 = vmul.f32 -1.442695, %v1034_v62  ;;  %v1796_v32 = vmul.f32 -1.442695, %v1067_v7 }
 0x391   :  { %1954 = vpow2.f32 %v1795_v27 }
 0x392   :  { %1956 = vpow2.f32 %v1796_v32 }
 0x393   :  { %v1096_v12 = vpop.f32.mrf.mxu2  ;;  %v1129_v9 = vpop.f32.mrf.mxu3 }
 0x394   :  { %v1100_v18 = vadd.f32 %v1096_v12, %v2711_v47  ;;  %v1032_v58 = vpop.f32.mrf.mxu0  ;;  %v1065_v33 = vpop.f32.mrf.mxu1  ;;  %v1133_v3 = vadd.f32 %v1129_v9, %v2712_v13 }
 0x396   :  { %v1797_v59 = vmul.f32 -1.442695, %v1100_v18 }
 0x397   :  { %v1955_v15 = vpop.eup %1954 }
 0x398   :  { %v1957_v24 = vpop.eup %1956  ;;  %v1038_v11 = vadd.f32 1.0, %v1955_v15  ;;  %1958 = vpow2.f32 %v1797_v59 }
 0x399   :  { %v1071_v56 = vadd.f32 1.0, %v1957_v24 }
 0x39a   :  { %1960 = vrcp.f32 %v1038_v11  ;;  %v1050_v8 = vand.u32 2147483648, %v1038_v11  ;;  %v1048_v62 = vand.u32 2147483647, %v1038_v11  ;;  %vm1044_vm7 = vweird.f32 %v1038_v11 }
 0x39b   :  { %1962 = vrcp.f32 %v1071_v56  ;;  %v1098_v61 = vpop.f32.mrf.mxu2  ;;  %v1131_v49 = vpop.f32.mrf.mxu3  ;;  %v1083_v21 = vand.u32 2147483648, %v1071_v56  ;;  %v1081_v7 = vand.u32 2147483647, %v1071_v56  ;;  %vm1077_vm8 = vweird.f32 %v1071_v56 }
 0x39c   :  { %v1051_v9 = vor.u32 1.1754944e-38, %v1050_v8  ;;  %vm1049_vm11 = vcmp.eq.f32.partialorder %v1048_v62, 8.507059e+37 }
 0x39d   :  { %v1084_v18 = vor.u32 1.1754944e-38, %v1083_v21  ;;  %vm1082_vm12 = vcmp.eq.f32.partialorder %v1081_v7, 8.507059e+37 }
 0x39e   :  { %v1959_v20 = vpop.eup %1958 }
 0x39f   :  { %v1104_v22 = vadd.f32 1.0, %v1959_v20 }
 0x3a0   :  { %v1961_v46 = vpop.eup %1960 }
 0x3a1   :  { %v1963_v17 = vpop.eup %1962  ;;  %v1040_v39 = vmul.f32 %v1961_v46, %v1038_v11  ;;  %1964 = vrcp.f32 %v1104_v22  ;;  %vm1045_vm5 = vweird.f32 %v1961_v46  ;;  %vm1110_vm14 = vweird.f32 %v1104_v22 }
 0x3a2   :  { %v1073_v50 = vmul.f32 %v1963_v17, %v1071_v56  ;;  %1966 = vtanh.f32 %v1133_v3  ;;  %vm1078_vm6 = vweird.f32 %v1963_v17  ;;  %vm1046_vm9 = vmor %vm1044_vm7, %vm1045_vm5  ;;  %v1116_v3 = vand.u32 2147483648, %v1104_v22 }
 0x3a3   :  { %v1041_v5 = vsub.f32 1.0, %v1040_v39  ;;  %vm1079_vm10 = vmor %vm1077_vm8, %vm1078_vm6 }
 0x3a4   :  { %v1074_v40 = vsub.f32 1.0, %v1073_v50  ;;  %v1117_v50 = vor.u32 1.1754944e-38, %v1116_v3 }
 0x3a5   :  { %v1042_v41 = vmul.f32 %v1961_v46, %v1041_v5 }
 0x3a6   :  { %v1075_v10 = vmul.f32 %v1963_v17, %v1074_v40 }
 0x3a7   :  { %v1965_v27 = vpop.eup %1964  ;;  %v1043_v32 = vadd.f32 %v1961_v46, %v1042_v41 }
 0x3a8   :  { %v1106_v12 = vmul.f32 %v1965_v27, %v1104_v22  ;;  %v1076_v47 = vadd.f32 %v1963_v17, %v1075_v10  ;;  %v1967_v33 = vpop.eup %1966  ;;  %vm1111_vm13 = vweird.f32 %v1965_v27 }
 0x3a9   :  { %v1047_v58 = vsel %vm1046_vm9, %v1961_v46, %v1043_v32  ;;  %v1114_v46 = vand.u32 2147483647, %v1104_v22  ;;  %vm1112_vm15 = vmor %vm1110_vm14, %vm1111_vm13 }
 0x3aa   :  { %v1107_v59 = vsub.f32 1.0, %v1106_v12  ;;  %v1052_v15 = vsel %vm1049_vm11, %v1051_v9, %v1047_v58  ;;  %v1080_v24 = vsel %vm1079_vm10, %v1963_v17, %v1076_v47 }
 0x3ab   :  { %v1085_v61 = vsel %vm1082_vm12, %v1084_v18, %v1080_v24  ;;  %v1136_v49 = vmul.f32 %v1967_v33, %v1052_v15  ;;  %vm1115_vm0 = vcmp.eq.f32.partialorder %v1114_v46, 8.507059e+37 }
 0x3ac   :  { %v1135_v20 = vmul.f32 %v1085_v61, %v2550_v34  ;;  %v1108_v13 = vmul.f32 %v1965_v27, %v1107_v59 }
 0x3ae   :  { %v2590_v11 = vadd.f32 %v1136_v49, %v1135_v20  ;;  %v1109_v56 = vadd.f32 %v1965_v27, %v1108_v13 }
 0x3b0   :  { %1968 = vtanh.f32 %v2590_v11  ;;  %v1113_v39 = vsel %vm1112_vm15, %v1965_v27, %v1109_v56 }
 0x3b1   :  { %v1118_v5 = vsel %vm1115_vm0, %v1117_v50, %v1113_v39 }
 0x3b6   :  { %v1969_v17 = vpop.eup %1968 }
 0x3b7   :  { %v1139_v40 = vmul.f32 %v1969_v17, %v1118_v5 }
 0x3b9   :  { %v1140_v8 = vpack.c.bf16 %v1139_v40, %v1139_v40 }
 0x3bb   :  { %1153 = vmatmul.bf16.vlgmr.msra.gmra.mxu0 %v1140_v8  ;;  %1186 = vmatmul.bf16.vlgmr.msrb.gmra.mxu1 %v1140_v8 }
 0x3bc   :  { %1219 = vmatmul.bf16.vlgmr.msra.gmra.mxu2 %v1140_v8  ;;  %1252 = vmatmul.bf16.vlgmr.msra.gmra.mxu3 %v1140_v8 }
 0x3bd   :  { %1393 = vmatpush.bf16.msra.mxu0 %v2133_v16  ;;  %1426 = vmatpush.bf16.msrb.mxu1 %v2139_v25 }
 0x3be   :  { %1459 = vmatpush.bf16.msra.mxu2 %v2141_v26  ;;  %1492 = vmatpush.bf16.msra.mxu3 %v2150_v36  ;;  %v2713_v26 = vld [vmem:[#allocation17_spill] sm:$0xff]  ;;  %v2714_v36 = vld [vmem:[#allocation23_spill] sm:$0xff] }
 0x3c1   :  { %1394 = vmatpush.bf16.msra.mxu0 %v2144_v30  ;;  %1427 = vmatpush.bf16.msrb.mxu1 %v2158_v37 }
 0x3c2   :  { %1460 = vmatpush.bf16.msra.mxu2 %v2160_v38  ;;  %1493 = vmatpush.bf16.msra.mxu3 %v2166_v48 }
 0x3c5   :  { %1395 = vmatpush.bf16.msra.mxu0 %v2163_v42  ;;  %1428 = vmatpush.bf16.msrb.mxu1 %v2170_v51 }
 0x3c6   :  { %1461 = vmatpush.bf16.msra.mxu2 %v2172_v53  ;;  %1494 = vmatpush.bf16.msra.mxu3 %v2178_v57  ;;  %v2715_v53 = vld [vmem:[#allocation18_spill] sm:$0xff] }
 0x3c9   :  { %1396 = vmatpush.bf16.msra.mxu0 %v2175_v55  ;;  %1429 = vmatpush.bf16.msrb.mxu1 %v2182_v63 }
 0x3ca   :  { %1462 = vmatpush.bf16.msra.mxu2 %v2184_v0  ;;  %1495 = vmatpush.bf16.msra.mxu3 %v2190_v2 }
 0x3cd   :  { %1397 = vmatpush.bf16.msra.mxu0 %v2187_v1  ;;  %1430 = vmatpush.bf16.msrb.mxu1 %v2215_v23 }
 0x3ce   :  { %1463 = vmatpush.bf16.msra.mxu2 %v2207_v14  ;;  %1496 = vmatpush.bf16.msra.mxu3 %v2213_v19 }
 0x3d1   :  { %1398 = vmatpush.bf16.msra.mxu0 %v2200_v6  ;;  %1431 = vmatpush.bf16.msrb.mxu1 %v2227_v35  ;;  %v2716_v35 = vld [vmem:[#allocation19_spill] sm:$0xff] }
 0x3d2   :  { %1464 = vmatpush.bf16.msra.mxu2 %v2222_v29  ;;  %1497 = vmatpush.bf16.msra.mxu3 %v2224_v31 }
 0x3d5   :  { %1399 = vmatpush.bf16.msra.mxu0 %v2219_v28  ;;  %1432 = vmatpush.bf16.msrb.mxu1 %v2258_v60 }
 0x3d6   :  { %1465 = vmatpush.bf16.msra.mxu2 %v2230_v43  ;;  %1498 = vmatpush.bf16.msra.mxu3 %v2236_v45 }
 0x3d9   :  { %1400 = vmatpush.bf16.msra.mxu0 %v2233_v44  ;;  %1433 = vmatpush.bf16.msrb.mxu1 %v2263_v4 }
 0x3da   :  { %1466 = vmatpush.bf16.msra.mxu2 %v2240_v52  ;;  %1499 = vmatpush.bf16.msra.mxu3 %v2244_v54 }
 0x438   :  { %v1154_v16 = vpop.f32.mrf.mxu0  ;;  %v1187_v25 = vpop.f32.mrf.mxu1 }
 0x439   :  { %v1158_v30 = vadd.f32 %v1154_v16, %v2713_v26  ;;  %v1191_v37 = vadd.f32 %v1187_v25, %v2714_v36  ;;  %v2717_v16 = vld [vmem:[#allocation10_spill] sm:$0xff] }
 0x43a   :  { %v2718_v26 = vld [vmem:[#allocation26_spill] sm:$0xff] }
 0x43b   :  { %v1798_v38 = vmul.f32 -1.442695, %v1158_v30  ;;  %v1799_v42 = vmul.f32 -1.442695, %v1191_v37 }
 0x43d   :  { %1970 = vpow2.f32 %v1798_v38 }
 0x43e   :  { %1972 = vpow2.f32 %v1799_v42 }
 0x43f   :  { %v1220_v48 = vpop.f32.mrf.mxu2  ;;  %v1253_v51 = vpop.f32.mrf.mxu3 }
 0x440   :  { %v1224_v55 = vadd.f32 %v1220_v48, %v2715_v53  ;;  %v1156_v57 = vpop.f32.mrf.mxu0  ;;  %v1189_v63 = vpop.f32.mrf.mxu1  ;;  %v1257_v43 = vadd.f32 %v1253_v51, %v2716_v35  ;;  %v2719_v48 = vld [vmem:[#allocation21_spill] sm:$0xff] }
 0x442   :  { %v1800_v0 = vmul.f32 -1.442695, %v1224_v55 }
 0x443   :  { %v1971_v1 = vpop.eup %1970 }
 0x444   :  { %v1973_v2 = vpop.eup %1972  ;;  %v1162_v6 = vadd.f32 1.0, %v1971_v1  ;;  %1974 = vpow2.f32 %v1800_v0 }
 0x445   :  { %v1195_v14 = vadd.f32 1.0, %v1973_v2 }
 0x446   :  { %1976 = vrcp.f32 %v1162_v6  ;;  %v1174_v4 = vand.u32 2147483648, %v1162_v6  ;;  %v1172_v21 = vand.u32 2147483647, %v1162_v6  ;;  %vm1168_vm4 = vweird.f32 %v1162_v6 }
 0x447   :  { %1978 = vrcp.f32 %v1195_v14  ;;  %v1222_v19 = vpop.f32.mrf.mxu2  ;;  %v1255_v23 = vpop.f32.mrf.mxu3  ;;  %v1207_v34 = vand.u32 2147483648, %v1195_v14  ;;  %v1205_v62 = vand.u32 2147483647, %v1195_v14  ;;  %vm1201_vm5 = vweird.f32 %v1195_v14 }
 0x448   :  { %v1175_v32 = vor.u32 1.1754944e-38, %v1174_v4  ;;  %vm1173_vm8 = vcmp.eq.f32.partialorder %v1172_v21, 8.507059e+37 }
 0x449   :  { %v1208_v9 = vor.u32 1.1754944e-38, %v1207_v34  ;;  %vm1206_vm9 = vcmp.eq.f32.partialorder %v1205_v62, 8.507059e+37 }
 0x44a   :  { %v1975_v28 = vpop.eup %1974 }
 0x44b   :  { %v1228_v29 = vadd.f32 1.0, %v1975_v28 }
 0x44c   :  { %v1977_v31 = vpop.eup %1976 }
 0x44d   :  { %v1979_v44 = vpop.eup %1978  ;;  %v1164_v45 = vmul.f32 %v1977_v31, %v1162_v6  ;;  %1980 = vrcp.f32 %v1228_v29  ;;  %vm1169_vm2 = vweird.f32 %v1977_v31  ;;  %v1240_v56 = vand.u32 2147483648, %v1228_v29 }
 0x44e   :  { %v1197_v52 = vmul.f32 %v1979_v44, %v1195_v14  ;;  %1982 = vtanh.f32 %v1257_v43  ;;  %vm1202_vm3 = vweird.f32 %v1979_v44  ;;  %vm1170_vm6 = vmor %vm1168_vm4, %vm1169_vm2  ;;  %vm1234_vm11 = vweird.f32 %v1228_v29 }
 0x44f   :  { %v1165_v54 = vsub.f32 1.0, %v1164_v45  ;;  %vm1203_vm7 = vmor %vm1201_vm5, %vm1202_vm3  ;;  %v1238_v3 = vand.u32 2147483647, %v1228_v29  ;;  %v1241_v39 = vor.u32 1.1754944e-38, %v1240_v56 }
 0x450   :  { %v1198_v60 = vsub.f32 1.0, %v1197_v52 }
 0x451   :  { %v1166_v22 = vmul.f32 %v1977_v31, %v1165_v54  ;;  %vm1239_vm13 = vcmp.eq.f32.partialorder %v1238_v3, 8.507059e+37 }
 0x452   :  { %v1199_v41 = vmul.f32 %v1979_v44, %v1198_v60 }
 0x453   :  { %v1981_v10 = vpop.eup %1980  ;;  %v1167_v7 = vadd.f32 %v1977_v31, %v1166_v22 }
 0x454   :  { %v1230_v27 = vmul.f32 %v1981_v10, %v1228_v29  ;;  %v1200_v12 = vadd.f32 %v1979_v44, %v1199_v41  ;;  %v1983_v18 = vpop.eup %1982  ;;  %vm1235_vm10 = vweird.f32 %v1981_v10  ;;  %v2720_v29 = vld [vmem:[#allocation22_spill] sm:$0xff] }
 0x455   :  { %v1171_v47 = vsel %vm1170_vm6, %v1977_v31, %v1167_v7  ;;  %vm1236_vm12 = vmor %vm1234_vm11, %vm1235_vm10 }
 0x456   :  { %v1231_v58 = vsub.f32 1.0, %v1230_v27  ;;  %v1176_v33 = vsel %vm1173_vm8, %v1175_v32, %v1171_v47  ;;  %v1204_v59 = vsel %vm1203_vm7, %v1979_v44, %v1200_v12 }
 0x457   :  { %v1209_v15 = vsel %vm1206_vm9, %v1208_v9, %v1204_v59  ;;  %v1260_v24 = vmul.f32 %v1983_v18, %v1176_v33 }
 0x458   :  { %v1259_v61 = vmul.f32 %v1209_v15, %v2590_v11  ;;  %v1232_v49 = vmul.f32 %v1981_v10, %v1231_v58 }
 0x45a   :  { %v2630_v20 = vadd.f32 %v1260_v24, %v1259_v61  ;;  %v1233_v13 = vadd.f32 %v1981_v10, %v1232_v49 }
 0x45c   :  { %1984 = vtanh.f32 %v2630_v20  ;;  %v1237_v46 = vsel %vm1236_vm12, %v1981_v10, %v1233_v13 }
 0x45d   :  { %v1242_v17 = vsel %vm1239_vm13, %v1241_v39, %v1237_v46 }
 0x462   :  { %v1985_v50 = vpop.eup %1984 }
 0x463   :  { %v1263_v5 = vmul.f32 %v1985_v50, %v1242_v17 }
 0x465   :  { %v1264_v40 = vpack.c.bf16 %v1263_v5, %v1263_v5 }
 0x467   :  { %1277 = vmatmul.bf16.vlgmr.msrb.gmra.mxu0 %v1264_v40  ;;  %1310 = vmatmul.bf16.vlgmr.msra.gmra.mxu1 %v1264_v40 }
 0x468   :  { %1343 = vmatmul.bf16.vlgmr.msrb.gmra.mxu2 %v1264_v40  ;;  %1376 = vmatmul.bf16.vlgmr.msrb.gmra.mxu3 %v1264_v40  ;;  %v1881_v40 = vld [vmem:[%s2684_s4 + $0x30] sm:$0xff] }
 0x4e4   :  { %v1278_v11 = vpop.f32.mrf.mxu0  ;;  %v1311_v8 = vpop.f32.mrf.mxu1 }
 0x4e5   :  { %v1282_v25 = vadd.f32 %v1278_v11, %v2717_v16  ;;  %v1315_v30 = vadd.f32 %v1311_v8, %v2718_v26  ;;  %v1880_v11 = vld [vmem:[%s2684_s4 + $0x28] sm:$0xff]  ;;  %v1879_v8 = vld [vmem:[%s2684_s4 + $0x20] sm:$0xff]  ;;  %v1878_v16 = vld [vmem:[%s2684_s4 + $0x18] sm:$0xff] }
 0x4e6   :  { %v2722_v26 = vld [vmem:[#allocation11_spill] sm:$0xff] }
 0x4e7   :  { %v1801_v36 = vmul.f32 -1.442695, %v1282_v25  ;;  %v1802_v37 = vmul.f32 -1.442695, %v1315_v30  ;;  %v2721_v25 = vld [vmem:[#allocation9_spill] sm:$0xff] }
 0x4e8   :  { %v144_v30 = vadd.f32 %v2722_v26, %v2721_v25 }
 0x4e9   :  { %1986 = vpow2.f32 %v1801_v36 }
 0x4ea   :  { %1988 = vpow2.f32 %v1802_v37 }
 0x4eb   :  { %v1344_v38 = vpop.f32.mrf.mxu2  ;;  %v1377_v42 = vpop.f32.mrf.mxu3 }
 0x4ec   :  { %v1348_v51 = vadd.f32 %v1344_v38, %v2719_v48  ;;  %v1280_v53 = vpop.f32.mrf.mxu0  ;;  %v1313_v55 = vpop.f32.mrf.mxu1  ;;  %v1381_v31 = vadd.f32 %v1377_v42, %v2720_v29  ;;  %v2723_v42 = vld [vmem:[#allocation27_spill] sm:$0xff] }
 0x4ee   :  { %v1803_v57 = vmul.f32 -1.442695, %v1348_v51  ;;  %v1877_v51 = vld [vmem:[%s2684_s4 + $0x10] sm:$0xff] }
 0x4ef   :  { %v1987_v63 = vpop.eup %1986 }
 0x4f0   :  { %v1989_v0 = vpop.eup %1988  ;;  %v1286_v1 = vadd.f32 1.0, %v1987_v63  ;;  %1990 = vpow2.f32 %v1803_v57  ;;  %v1876_v57 = vld [vmem:[%s2684_s4 + $0x8] sm:$0xff] }
 0x4f1   :  { %v1319_v2 = vadd.f32 1.0, %v1989_v0 }
 0x4f2   :  { %1992 = vrcp.f32 %v1286_v1  ;;  %v1298_v54 = vand.u32 2147483648, %v1286_v1  ;;  %v1296_v34 = vand.u32 2147483647, %v1286_v1  ;;  %vm1292_vm0 = vweird.f32 %v1286_v1 }
 0x4f3   :  { %1994 = vrcp.f32 %v1319_v2  ;;  %v1346_v6 = vpop.f32.mrf.mxu2  ;;  %v1379_v14 = vpop.f32.mrf.mxu3  ;;  %v1331_v60 = vand.u32 2147483648, %v1319_v2  ;;  %v1329_v21 = vand.u32 2147483647, %v1319_v2  ;;  %vm1325_vm2 = vweird.f32 %v1319_v2 }
 0x4f4   :  { %v1299_v7 = vor.u32 1.1754944e-38, %v1298_v54  ;;  %vm1297_vm5 = vcmp.eq.f32.partialorder %v1296_v34, 8.507059e+37 }
 0x4f5   :  { %v1332_v32 = vor.u32 1.1754944e-38, %v1331_v60  ;;  %vm1330_vm6 = vcmp.eq.f32.partialorder %v1329_v21, 8.507059e+37  ;;  %v2725_v60 = vld [vmem:[#allocation25_spill] sm:$0xff] }
 0x4f6   :  { %v1991_v19 = vpop.eup %1990 }
 0x4f7   :  { %v1352_v23 = vadd.f32 1.0, %v1991_v19  ;;  %v1875_v19 = vld [vmem:[%s2684_s4] sm:$0xff] }
 0x4f8   :  { %v1993_v28 = vpop.eup %1992 }
 0x4f9   :  { %v1995_v35 = vpop.eup %1994  ;;  %v1288_v43 = vmul.f32 %v1993_v28, %v1286_v1  ;;  %1996 = vrcp.f32 %v1352_v23  ;;  %vm1293_vm14 = vweird.f32 %v1993_v28  ;;  %v1364_v13 = vand.u32 2147483648, %v1352_v23  ;;  %v2724_v1 = vld [vmem:[#allocation24_spill] sm:$0xff] }
 0x4fa   :  { %v1321_v44 = vmul.f32 %v1995_v35, %v1319_v2  ;;  %1998 = vtanh.f32 %v1381_v31  ;;  %vm1326_vm15 = vweird.f32 %v1995_v35  ;;  %vm1294_vm3 = vmor %vm1292_vm0, %vm1293_vm14  ;;  %vm1358_vm8 = vweird.f32 %v1352_v23 }
 0x4fb   :  { %v1289_v45 = vsub.f32 1.0, %v1288_v43  ;;  %vm1327_vm4 = vmor %vm1325_vm2, %vm1326_vm15  ;;  %v1362_v56 = vand.u32 2147483647, %v1352_v23  ;;  %v1365_v46 = vor.u32 1.1754944e-38, %v1364_v13 }
 0x4fc   :  { %v1322_v52 = vsub.f32 1.0, %v1321_v44 }
 0x4fd   :  { %v1290_v4 = vmul.f32 %v1993_v28, %v1289_v45  ;;  %vm1363_vm10 = vcmp.eq.f32.partialorder %v1362_v56, 8.507059e+37 }
 0x4fe   :  { %v1323_v22 = vmul.f32 %v1995_v35, %v1322_v52 }
 0x4ff   :  { %v1997_v41 = vpop.eup %1996  ;;  %v1291_v62 = vadd.f32 %v1993_v28, %v1290_v4 }
 0x500   :  { %v1354_v10 = vmul.f32 %v1997_v41, %v1352_v23  ;;  %v1324_v27 = vadd.f32 %v1995_v35, %v1323_v22  ;;  %v1999_v9 = vpop.eup %1998  ;;  %vm1359_vm7 = vweird.f32 %v1997_v41 }
 0x501   :  { %v1295_v12 = vsel %vm1294_vm3, %v1993_v28, %v1291_v62  ;;  %vm1360_vm9 = vmor %vm1358_vm8, %vm1359_vm7 }
 0x502   :  { %v1355_v47 = vsub.f32 1.0, %v1354_v10  ;;  %v1300_v18 = vsel %vm1297_vm5, %v1299_v7, %v1295_v12  ;;  %v1328_v58 = vsel %vm1327_vm4, %v1995_v35, %v1324_v27 }
 0x503   :  { %v1333_v33 = vsel %vm1330_vm6, %v1332_v32, %v1328_v58  ;;  %v1384_v59 = vmul.f32 %v1999_v9, %v1300_v18 }
 0x504   :  { %v1383_v15 = vmul.f32 %v1333_v33, %v2630_v20  ;;  %v1356_v24 = vmul.f32 %v1997_v41, %v1355_v47  ;;  %v1882_v20 = vld [vmem:[%s2684_s4 + $0x38] sm:$0xff] }
 0x505   :  { %1581 = vmatpush.bf16.msrb.mxu0 %v1882_v20 }
 0x506   :  { %v2638_v61 = vadd.f32 %v1384_v59, %v1383_v15  ;;  %v1357_v49 = vadd.f32 %v1997_v41, %v1356_v24 }
 0x508   :  { %2000 = vtanh.f32 %v2638_v61  ;;  %v1361_v3 = vsel %vm1360_vm9, %v1997_v41, %v1357_v49 }
 0x509   :  { %v1366_v50 = vsel %vm1363_vm10, %v1365_v46, %v1361_v3  ;;  %1582 = vmatpush.bf16.msrb.mxu0 %v1881_v40 }
 0x50d   :  { %1583 = vmatpush.bf16.msrb.mxu0 %v1880_v11 }
 0x50e   :  { %v2001_v39 = vpop.eup %2000 }
 0x50f   :  { %v1387_v17 = vmul.f32 %v2001_v39, %v1366_v50 }
 0x511   :  { %v1388_v5 = vpack.c.bf16 %v1387_v17, %v1387_v17  ;;  %1584 = vmatpush.bf16.msrb.mxu0 %v1879_v8 }
 0x513   :  { %1401 = vmatmul.bf16.vlgmr.msra.gmra.mxu0 %v1388_v5  ;;  %1434 = vmatmul.bf16.vlgmr.msrb.gmra.mxu1 %v1388_v5 }
 0x514   :  { %1467 = vmatmul.bf16.vlgmr.msra.gmra.mxu2 %v1388_v5  ;;  %1500 = vmatmul.bf16.vlgmr.msra.gmra.mxu3 %v1388_v5 }
 0x515   :  { %1585 = vmatpush.bf16.msrb.mxu0 %v1878_v16 }
 0x519   :  { %1586 = vmatpush.bf16.msrb.mxu0 %v1877_v51 }
 0x51d   :  { %1587 = vmatpush.bf16.msrb.mxu0 %v1876_v57 }
 0x521   :  { %1588 = vmatpush.bf16.msrb.mxu0 %v1875_v19 }
 0x590   :  { %v1402_v36 = vpop.f32.mrf.mxu0  ;;  %v1435_v37 = vpop.f32.mrf.mxu1 }
 0x591   :  { %v1406_v38 = vadd.f32 %v1402_v36, %v144_v30  ;;  %v1439_v48 = vadd.f32 %v1435_v37, %v2723_v42 }
 0x593   :  { %v1804_v53 = vmul.f32 -1.442695, %v1406_v38  ;;  %v1805_v55 = vmul.f32 -1.442695, %v1439_v48 }
 0x595   :  { %2002 = vpow2.f32 %v1804_v53 }
 0x596   :  { %2004 = vpow2.f32 %v1805_v55 }
 0x597   :  { %v1468_v63 = vpop.f32.mrf.mxu2  ;;  %v1501_v0 = vpop.f32.mrf.mxu3 }
 0x598   :  { %v1472_v2 = vadd.f32 %v1468_v63, %v2724_v1  ;;  %v1404_v6 = vpop.f32.mrf.mxu0  ;;  %v1437_v14 = vpop.f32.mrf.mxu1  ;;  %v1505_v4 = vadd.f32 %v1501_v0, %v2725_v60 }
 0x59a   :  { %v1806_v23 = vmul.f32 -1.442695, %v1472_v2 }
 0x59b   :  { %v2003_v28 = vpop.eup %2002 }
 0x59c   :  { %v2005_v29 = vpop.eup %2004  ;;  %v1410_v31 = vadd.f32 1.0, %v2003_v28  ;;  %2006 = vpow2.f32 %v1806_v23 }
 0x59d   :  { %v1443_v35 = vadd.f32 1.0, %v2005_v29 }
 0x59e   :  { %2008 = vrcp.f32 %v1410_v31  ;;  %v1422_v10 = vand.u32 2147483648, %v1410_v31  ;;  %v1420_v32 = vand.u32 2147483647, %v1410_v31  ;;  %vm1416_vm13 = vweird.f32 %v1410_v31 }
 0x59f   :  { %2010 = vrcp.f32 %v1443_v35  ;;  %v1470_v43 = vpop.f32.mrf.mxu2  ;;  %v1503_v44 = vpop.f32.mrf.mxu3  ;;  %v1455_v7 = vand.u32 2147483648, %v1443_v35  ;;  %v1453_v9 = vand.u32 2147483647, %v1443_v35  ;;  %vm1449_vm14 = vweird.f32 %v1443_v35 }
 0x5a0   :  { %v1423_v33 = vor.u32 1.1754944e-38, %v1422_v10  ;;  %vm1421_vm2 = vcmp.eq.f32.partialorder %v1420_v32, 8.507059e+37 }
 0x5a1   :  { %v1456_v15 = vor.u32 1.1754944e-38, %v1455_v7  ;;  %vm1454_vm3 = vcmp.eq.f32.partialorder %v1453_v9, 8.507059e+37 }
 0x5a2   :  { %v2007_v45 = vpop.eup %2006 }
 0x5a3   :  { %v1476_v52 = vadd.f32 1.0, %v2007_v45 }
 0x5a4   :  { %v2009_v54 = vpop.eup %2008 }
 0x5a5   :  { %v2011_v34 = vpop.eup %2010  ;;  %v1412_v22 = vmul.f32 %v2009_v54, %v1410_v31  ;;  %2012 = vrcp.f32 %v1476_v52  ;;  %vm1417_vm11 = vweird.f32 %v2009_v54  ;;  %v1488_v40 = vand.u32 2147483648, %v1476_v52 }
 0x5a6   :  { %v1445_v21 = vmul.f32 %v2011_v34, %v1443_v35  ;;  %2014 = vtanh.f32 %v1505_v4  ;;  %vm1450_vm12 = vweird.f32 %v2011_v34  ;;  %vm1418_vm15 = vmor %vm1416_vm13, %vm1417_vm11  ;;  %vm1482_vm5 = vweird.f32 %v1476_v52 }
 0x5a7   :  { %v1413_v41 = vsub.f32 1.0, %v1412_v22  ;;  %vm1451_vm0 = vmor %vm1449_vm14, %vm1450_vm12  ;;  %v1486_v11 = vand.u32 2147483647, %v1476_v52  ;;  %v1489_v16 = vor.u32 1.1754944e-38, %v1488_v40 }
 0x5a8   :  { %v1446_v62 = vsub.f32 1.0, %v1445_v21 }
 0x5a9   :  { %v1414_v27 = vmul.f32 %v2009_v54, %v1413_v41  ;;  %vm1487_vm7 = vcmp.eq.f32.partialorder %v1486_v11, 8.507059e+37 }
 0x5aa   :  { %v1447_v12 = vmul.f32 %v2011_v34, %v1446_v62 }
 0x5ab   :  { %v2013_v47 = vpop.eup %2012  ;;  %v1415_v18 = vadd.f32 %v2009_v54, %v1414_v27 }
 0x5ac   :  { %v1478_v58 = vmul.f32 %v2013_v47, %v1476_v52  ;;  %v1448_v59 = vadd.f32 %v2011_v34, %v1447_v12  ;;  %v2015_v49 = vpop.eup %2014  ;;  %vm1483_vm4 = vweird.f32 %v2013_v47 }
 0x5ad   :  { %v1419_v24 = vsel %vm1418_vm15, %v2009_v54, %v1415_v18  ;;  %vm1484_vm6 = vmor %vm1482_vm5, %vm1483_vm4 }
 0x5ae   :  { %v1479_v13 = vsub.f32 1.0, %v1478_v58  ;;  %v1424_v56 = vsel %vm1421_vm2, %v1423_v33, %v1419_v24  ;;  %v1452_v3 = vsel %vm1451_vm0, %v2011_v34, %v1448_v59 }
 0x5af   :  { %v1457_v46 = vsel %vm1454_vm3, %v1456_v15, %v1452_v3  ;;  %v1508_v39 = vmul.f32 %v2015_v49, %v1424_v56 }
 0x5b0   :  { %v1507_v50 = vmul.f32 %v1457_v46, %v2638_v61  ;;  %v1480_v17 = vmul.f32 %v2013_v47, %v1479_v13  ;;  %v1889_v61 = vld [vmem:[%s2685_s5] ss:$0 sm:$0xff] }
 0x5b2   :  { %v1509_v5 = vadd.f32 %v1508_v39, %v1507_v50  ;;  %v1481_v20 = vadd.f32 %v2013_v47, %v1480_v17 }
 0x5b4   :  { %2016 = vtanh.f32 %v1509_v5  ;;  %v1485_v8 = vsel %vm1484_vm6, %v2013_v47, %v1481_v20 }
 0x5b5   :  { %v1490_v26 = vsel %vm1487_vm7, %v1489_v16, %v1485_v8 }
 0x5ba   :  { %v2017_v25 = vpop.eup %2016 }
 0x5bb   :  { %v1511_v30 = vmul.f32 %v2017_v25, %v1490_v26 }
 0x5bd   :  { %v1512_v36 = vpack.c.bf16 %v1511_v30, %v1511_v30 }
 0x5bf   :  { %1589 = vmatmul.bf16.vlgmr.msrb.gmra.mxu0 %v1512_v36 }
 0x63c   :  { %v1590_v37 = vpop.f32.mrf.mxu0 }
 0x63d   :  { %v1591_v38 = vadd.f32 %v1889_v61, %v1590_v37 }
 0x63f   :  { %v1594_v42 = vsel %vm91_vm1, %v1591_v38, -inf }
 0x640   :  { %1595 = vmax.xlane.f32.xlu0 %v1594_v42 }
 0x644   :  { %v1592_v48 = vpop.f32.mrf.mxu0 }
 0x6b3   :  { %v1596_v51 = vpop.xlane.xlu0 %1595 }
 0x6b4   :  { %v1597_v53 = vsub.f32 %v1591_v38, %v1596_v51 }
 0x6b6   :  { %v1598_v55 = vmul.f32 1.442695, %v1597_v53 }
 0x6b8   :  { %2018 = vpow2.f32 %v1598_v55 }
 0x6be   :  { %v2019_v57 = vpop.eup %2018 }
 0x6bf   :  { %v1600_v63 = vsel %vm91_vm1, %v2019_v57, 0.0 }
 0x6c0   :  { %1601 = vadd.xlane.f32.xlu0 %v1600_v63 }
 0x733   :  { %v1602_v0 = vpop.xlane.xlu0 %1601 }
 0x734   :  { %2020 = vrcp.f32 %v1602_v0 }
 0x73a   :  { %v2021_v1 = vpop.eup %2020 }
 0x73b   :  { %v1604_v2 = vmul.f32 %v2021_v1, %v2019_v57 }
 0x73d   :  { %1605 = vst.msk [vmem:[#allocation6] sm:$0xff] %vm91_vm1, %v1604_v2 }
 0x73e   :  { %1616 = dma.vmem_to_hbm [thread:$0]  %s1612_s2, 128, %s1614_s9, [#allocation5]  }
 0x73f   :  { %2072 = dma.done.wait [#allocation5], 128  }
 0x740   :  { %2073 = vsyncadd [#allocation5], 4294967168 }
 0x741   :  { %1621 = vsyncpa [#allocation4], 1 }
 0x742   :  { %1622 = vsyncpa [#allocation5], 1 }

</bundles_post_ra>
